<compile_context>
chip_gen: v5e
topology: v5e:2x2
jax: 0.10.0
libtpu: 0.0.40
codegen_flags: <defaults>
</compile_context>

<pallas_src>
import jax
import jax.numpy as jnp
from jax.experimental import pallas as pl
from jax.experimental.pallas import tpu as pltpu

# ---- problem sizes (small, consistent with the module's __init__) -------------
B = 16            # batch per request (BN stats are taken over these rows)
IN_DIM = 32       # sum of feature embed dims
F1, F2 = 64, 64   # fcn_dims = [64, 64] -> fcn_dim = [32, 64, 64]
D = 2             # domain_num
K = 8             # adapter rank k
H0 = 32           # hyper_dims[0]; hyper_dims becomes [32, K*K]
KK = K * K
ADP = 32          # fixed "32" adapter mid width from the module
EPS_BN = 1e-5     # BatchNorm1d eps
EPS_LN = 1e-5     # self.eps
LANES = 128       # fused width = D * F1 = D * F2
NREQ = 8          # independent micro-batches processed by one pallas_call (grid axis)

# ---- row indices into the packed (17, 128) row-vector parameter slab ----------
R_BH0, R_GH0, R_BEH0 = 0, 1, 2
R_BH1, R_GH1, R_BEH1 = 3, 4, 5
R_B0, R_G0, R_BE0 = 6, 7, 8
R_B1, R_G1, R_BE1 = 9, 10, 11
R_BL0, R_BL1, R_GAMMA1, R_BIAS1, R_B2 = 12, 13, 14, 15, 16
N_PROWS = 17

# ---- row offsets into the packed (736, 128) bf16 weight slab (zero rows trimmed)
O_WH1 = 0      # (32, 128)   hyper layer 1, cols duplicated  [wh1 | wh1]
O_W1 = 32      # (128, 128)  block_diag(w1_d0, w1_d1)
O_U0R = 160    # (128, 128)  block_diag(u0 @ R, u0 @ R)
O_SV0 = 288    # (128, 128)  block_diag(S @ v0, S @ v0) (cols 0:64 valid)
O_U1R = 416    # (64, 128)   block_diag(u1 @ R, u1 @ R)
O_SV1 = 480    # (128, 128)  block_diag(S @ v1, S @ v1)
O_HEAD = 608   # (128, 128)  per-domain heads in cols 0:2
N_WROWS = 736


def _bn_train(x, gamma, beta):
    """Reference BatchNorm1d, training mode: batch mean / biased variance."""
    mean = jnp.mean(x, axis=0, keepdims=True)
    var = jnp.mean((x - mean) ** 2, axis=0, keepdims=True)
    return (x - mean) * jax.lax.rsqrt(var + EPS_BN) * gamma + beta


# ----------------------------------- kernel -------------------------------------
def mlp_adap_fused_kernel(emb_ref, did_ref, w01_ref, wmat_ref, pvec_ref, out_ref):
    f32 = jnp.float32
    emb = emb_ref[...]                                        # (B, IN_DIM) f32

    def row(i):                                               # (1, 128) static slice
        return pvec_ref[i:i + 1, :]

    def mm(a, roff, rlen):                                    # a @ packed bf16 block
        w = wmat_ref[roff:roff + rlen, :].astype(f32)
        return jnp.dot(a, w, preferred_element_type=f32)

    def bn(x, gamma, beta):
        # Training-mode BN: E[x^2]-mean^2 variance (independent reductions that
        # overlap in the XLU) + affine folded into one FMA per element.
        mean = jnp.mean(x, axis=0, keepdims=True)
        msq = jnp.mean(x * x, axis=0, keepdims=True)
        var = msq - mean * mean
        scale = gamma * jax.lax.rsqrt(var + EPS_BN)
        shift = beta - mean * scale
        return x * scale + shift

    # ---- fused first layer: one (32,256) RHS = [tower-0 (128 cols) | hyper-0 (pad 128)]
    zh = jnp.dot(emb, w01_ref[...].astype(f32), preferred_element_type=f32)   # (B,256)
    z = zh[:, :LANES] + row(R_B0)                             # (B,128) = [z_d0 | z_d1]
    h = zh[:, LANES:] + row(R_BH0)                            # (B,128), cols 32: stay 0

    z = jnp.maximum(bn(z, row(R_G0), row(R_BE0)), 0.0)
    h = jnp.maximum(bn(h, row(R_GH0), row(R_BEH0)), 0.0)

    # ---- hyper layer 1: only the 32 valid lanes of h feed the trimmed 32-row block
    h = mm(h[:, :H0], O_WH1, H0) + row(R_BH1)
    h128 = jnp.maximum(bn(h, row(R_GH1), row(R_BEH1)), 0.0)   # (B,128) = [hflat | hflat]

    # ---- tower layer 1
    z = mm(z, O_W1, LANES) + row(R_B1)
    z = jnp.maximum(bn(z, row(R_G1), row(R_BE1)), 0.0)        # (B,128) = [z_d0 | z_d1]

    # ---- adapter 1: sigmoid( ((z @ u0R) * H) @ Sv0 + bl0 )
    a1 = mm(mm(z, O_U0R, LANES) * h128, O_SV0, LANES) + row(R_BL0)
    a1 = jax.nn.sigmoid(a1)                                   # cols 64: hold sigmoid(0)=0.5

    # ---- adapter 2: only lanes 0:64 of a1 are meaningful -> trimmed 64-row U block
    a2 = mm(mm(a1[:, :2 * ADP], O_U1R, 2 * ADP) * h128, O_SV1, LANES) + row(R_BL1)

    # ---- explicit norm over batch (unbiased var) + affine + residual, via rsqrt/FMA
    n = a2.shape[0]
    mean = jnp.mean(a2, axis=0, keepdims=True)
    msq = jnp.mean(a2 * a2, axis=0, keepdims=True)
    var = (msq - mean * mean) * (n / (n - 1.0))
    scale = row(R_GAMMA1) * jax.lax.rsqrt(var + EPS_LN)
    z = a2 * scale + (row(R_BIAS1) - mean * scale) + z

    # ---- per-domain heads + sigmoid, then in-kernel domain row-select
    logits = jax.nn.sigmoid(mm(z, O_HEAD, LANES) + row(R_B2))  # (B,128), cols 0:D valid
    did = did_ref[...]                                          # (B,1) int32
    lane = jax.lax.broadcasted_iota(jnp.int32, logits.shape, 1)
    valid = (did >= 0) & (did < D)
    sel = jnp.where((lane == did) & valid, logits, 0.0)
    out_ref[...] = jnp.sum(sel, axis=1, keepdims=True)          # (B,1); invalid ids -> 0


# ---------------------------- parameter packing (runs once) ---------------------
def _block_diag2(a, b):
    top = jnp.concatenate([a, jnp.zeros((a.shape[0], b.shape[1]), a.dtype)], axis=1)
    bot = jnp.concatenate([jnp.zeros((b.shape[0], a.shape[1]), b.dtype), b], axis=1)
    return jnp.concatenate([top, bot], axis=0)


def build_fused_params(p):
    f32 = jnp.float32
    pad_cols = lambda a, n: jnp.pad(a, ((0, 0), (0, n - a.shape[1])))
    tile2 = lambda a: jnp.concatenate([a, a], axis=1)
    cat2 = lambda a: jnp.concatenate([a[0], a[1]], axis=1)

    # R expands t (len K) to K*K by repeating each entry K times; S group-reduces back.
    R = jnp.kron(jnp.eye(K, dtype=f32), jnp.ones((1, K), f32))   # (K, K*K)
    S = jnp.kron(jnp.ones((K, 1), f32), jnp.eye(K, dtype=f32))   # (K*K, K)

    u0R = p['u0'] @ R                       # (F2, KK)   entries are entries of u0
    u1R = p['u1'] @ R                       # (ADP, KK)
    Sv0 = S @ p['v0']                       # (KK, ADP)
    Sv1 = S @ p['v1']                       # (KK, F2)

    W_head = jnp.zeros((2 * F2, LANES), f32)
    W_head = W_head.at[0:F2, 0].set(p['w2'][0][:, 0])
    W_head = W_head.at[F2:2 * F2, 1].set(p['w2'][1][:, 0])

    # fused first-layer RHS: [ tower layer-0 (128 cols) | hyper layer-0 (32 cols, padded) ]
    W01 = jnp.concatenate([cat2(p['w0']), pad_cols(p['wh0'], LANES)],
                          axis=1).astype(jnp.bfloat16)            # (32, 256)

    W_all = jnp.concatenate([
        tile2(p['wh1']),                                  # O_WH1 (32,128)
        _block_diag2(p['w1'][0], p['w1'][1]),             # O_W1  (128,128)
        _block_diag2(u0R, u0R),                           # O_U0R (128,128)
        pad_cols(_block_diag2(Sv0, Sv0), LANES),          # O_SV0 (128,128)
        _block_diag2(u1R, u1R),                           # O_U1R (64,128)
        _block_diag2(Sv1, Sv1),                           # O_SV1 (128,128)
        W_head,                                           # O_HEAD (128,128)
    ], axis=0).astype(jnp.bfloat16)
    assert W01.shape == (IN_DIM, 2 * LANES)
    assert W_all.shape == (N_WROWS, LANES)

    b2_row = jnp.zeros((1, LANES), f32)
    b2_row = b2_row.at[0, 0].set(p['b2'][0, 0, 0]).at[0, 1].set(p['b2'][1, 0, 0])
    V_all = jnp.concatenate([
        pad_cols(p['bh0'], LANES), pad_cols(p['gh0'], LANES), pad_cols(p['beh0'], LANES),
        tile2(p['bh1']), tile2(p['gh1']), tile2(p['beh1']),
        cat2(p['b0']), cat2(p['g0']), cat2(p['be0']),
        cat2(p['b1']), cat2(p['g1']), cat2(p['be1']),
        pad_cols(tile2(p['bl0']), LANES),
        tile2(p['bl1']), tile2(p['gamma1']), tile2(p['bias1']),
        b2_row,
    ], axis=0).astype(f32)
    assert V_all.shape == (N_PROWS, LANES)
    return W01, W_all, V_all


# ----------------------------------- wrapper ------------------------------------
def mlp_adap_forward(emb, domain_id, W01, W_all, V_all):
    nreq = emb.shape[0] // B
    return pl.pallas_call(
        mlp_adap_fused_kernel,
        out_shape=jax.ShapeDtypeStruct((emb.shape[0], 1), jnp.float32),
        grid=(nreq,),
        in_specs=[
            pl.BlockSpec((B, IN_DIM), lambda i: (i, 0)),          # per-request activations
            pl.BlockSpec((B, 1), lambda i: (i, 0)),               # per-request domain ids
            # constant block indices -> weight/parameter slabs stay resident in VMEM
            pl.BlockSpec((IN_DIM, 2 * LANES), lambda i: (0, 0)),
            pl.BlockSpec((N_WROWS, LANES), lambda i: (0, 0)),
            pl.BlockSpec((N_PROWS, LANES), lambda i: (0, 0)),
        ],
        out_specs=pl.BlockSpec((B, 1), lambda i: (i, 0)),
        compiler_params=pltpu.CompilerParams(dimension_semantics=("parallel",)),
    )(emb, domain_id, W01, W_all, V_all)


# ------------------------- pure-JAX reference (for checking) --------------------
def reference_forward_one(emb, domain_id, p):
    outs = []
    for d in range(D):
        h = emb @ p['wh0'] + p['bh0']
        h = jax.nn.relu(_bn_train(h, p['gh0'], p['beh0']))
        h = h @ p['wh1'] + p['bh1']
        hflat = jax.nn.relu(_bn_train(h, p['gh1'], p['beh1']))
        hyper = hflat.reshape(emb.shape[0], K, K)

        z = emb @ p['w0'][d] + p['b0'][d]
        z = jax.nn.relu(_bn_train(z, p['g0'][d], p['be0'][d]))
        z = z @ p['w1'][d] + p['b1'][d]
        z = jax.nn.relu(_bn_train(z, p['g1'][d], p['be1'][d]))

        w1 = jnp.einsum('mi,bij,jn->bmn', p['u0'], hyper, p['v0'])
        tmp = jnp.einsum('bf,bfj->bj', z, w1) + p['bl0'][0]
        tmp = jax.nn.sigmoid(tmp)
        w2 = jnp.einsum('mi,bij,jn->bmn', p['u1'], hyper, p['v1'])
        tmp = jnp.einsum('bf,bfj->bj', tmp, w2) + p['bl1'][0]

        mean = tmp.mean(axis=0)
        var = tmp.var(axis=0, ddof=1)
        xn = (tmp - mean) / jnp.sqrt(var + EPS_LN)
        z = p['gamma1'][0] * xn + p['bias1'][0] + z

        outs.append(jax.nn.sigmoid(z @ p['w2'][d] + p['b2'][d]))

    final = jnp.zeros_like(outs[0])
    for d in range(D):
        final = jnp.where(domain_id == d, outs[d], final)
    return final


def reference_forward(emb_all, domain_id_all, p):
    outs = []
    for rq in range(emb_all.shape[0] // B):
        sl = slice(rq * B, (rq + 1) * B)
        outs.append(reference_forward_one(emb_all[sl], domain_id_all[sl], p))
    return jnp.concatenate(outs, axis=0)


# ----------------------------------- main ---------------------------------------
if __name__ == "__main__":
    key = jax.random.PRNGKey(0)
    ks = iter(jax.random.split(key, 64))

    def r(shape, s=0.1):
        # bf16-representable values so the bf16-packed weight slab is lossless
        # and the f32 reference comparison stays tight.
        v = (s * jax.random.normal(next(ks), shape)).astype(jnp.bfloat16)
        return v.astype(jnp.float32)

    params = {
        # per-domain tower (stacked over D)
        'w0': r((D, IN_DIM, F1)), 'b0': r((D, 1, F1)),
        'g0': 1.0 + r((D, 1, F1)), 'be0': r((D, 1, F1)),
        'w1': r((D, F1, F2)), 'b1': r((D, 1, F2)),
        'g1': 1.0 + r((D, 1, F2)), 'be1': r((D, 1, F2)),
        'w2': r((D, F2, 1)), 'b2': r((D, 1, 1)),
        # shared hyper-net
        'wh0': r((IN_DIM, H0)), 'bh0': r((1, H0)),
        'gh0': 1.0 + r((1, H0)), 'beh0': r((1, H0)),
        'wh1': r((H0, KK)), 'bh1': r((1, KK)),
        'gh1': 1.0 + r((1, KK)), 'beh1': r((1, KK)),
        # adapter params
        'u0': r((F2, K)), 'u1': r((ADP, K)),
        'v0': r((K, ADP)), 'v1': r((K, F2)),
        'bl0': r((1, ADP)), 'bl1': r((1, F2)),
        'gamma1': 1.0 + r((1, F2)), 'bias1': r((1, F2)),
    }

    emb = jax.random.normal(next(ks), (NREQ * B, IN_DIM), dtype=jnp.float32)
    domain_id = jax.random.randint(next(ks), (NREQ * B, 1), 0, D).astype(jnp.int32)

    # one-time parameter packing / domain fusion (pure JAX, outside the kernel)
    W01, W_all, V_all = build_fused_params(params)

    out = mlp_adap_forward(emb, domain_id, W01, W_all, V_all)
    out = jax.block_until_ready(out)

    ref = reference_forward(emb, domain_id, params)
    assert out.shape == (NREQ * B, 1)
    max_diff = jnp.max(jnp.abs(out - ref))
    assert jnp.allclose(out, ref, rtol=1e-4, atol=1e-4), f"max abs diff = {max_diff}"

    print("KERNEL_OK")
</pallas_src>

<mosaic_0001>
module attributes {stable_mosaic.version = 11 : i64} {
  func.func @mlp_adap_fused_kernel(%arg0: i32, %arg1: memref<16x32xf32, #tpu.memory_space<vmem>>, %arg2: memref<16x1xi32, #tpu.memory_space<vmem>>, %arg3: memref<32x256xbf16, #tpu.memory_space<vmem>>, %arg4: memref<736x128xbf16, #tpu.memory_space<vmem>>, %arg5: memref<17x128xf32, #tpu.memory_space<vmem>>, %arg6: memref<16x1xf32, #tpu.memory_space<vmem>>) attributes {dimension_semantics = [#tpu.dimension_semantics<parallel>], iteration_bounds = array<i64: 8>, scalar_prefetch = 0 : i64, scratch_operands = 0 : i64, tpu.core_type = #tpu.core_type<tc>, window_params = [{transform_indices = @transform_0, window_bounds = array<i64: 16, 32>}, {transform_indices = @transform_1, window_bounds = array<i64: 16, 1>}, {pipeline_mode = #tpu.pipeline_mode<synchronous>, transform_indices = @transform_2, window_bounds = array<i64: 32, 256>}, {pipeline_mode = #tpu.pipeline_mode<synchronous>, transform_indices = @transform_3, window_bounds = array<i64: 736, 128>}, {pipeline_mode = #tpu.pipeline_mode<synchronous>, transform_indices = @transform_4, window_bounds = array<i64: 17, 128>}, {transform_indices = @transform_5, window_bounds = array<i64: 16, 1>}]} {
    %c0 = arith.constant 0 : index
    %c0_0 = arith.constant 0 : index
    %0 = vector.load %arg1[%c0, %c0_0] : memref<16x32xf32, #tpu.memory_space<vmem>>, vector<16x32xf32>
    %c0_1 = arith.constant 0 : index
    %c0_2 = arith.constant 0 : index
    %1 = vector.load %arg3[%c0_1, %c0_2] : memref<32x256xbf16, #tpu.memory_space<vmem>>, vector<32x256xbf16>
    %2 = arith.extf %1 : vector<32x256xbf16> to vector<32x256xf32>
    %cst = arith.constant dense<0.000000e+00> : vector<16x256xf32>
    %3 = tpu.matmul %0, %2, %cst {dimension_numbers = #tpu.dot_dimension_numbers<[1], [0], [0], [1], [0, 0, 1, 1], [], []>} : vector<16x32xf32>, vector<32x256xf32>, vector<16x256xf32> -> vector<16x256xf32>
    %4 = vector.extract_strided_slice %3 {offsets = [0, 0], sizes = [16, 128], strides = [1, 1]} : vector<16x256xf32> to vector<16x128xf32>
    %c6 = arith.constant 6 : index
    %c0_3 = arith.constant 0 : index
    %5 = vector.load %arg5[%c6, %c0_3] : memref<17x128xf32, #tpu.memory_space<vmem>>, vector<1x128xf32>
    %6 = vector.broadcast %5 : vector<1x128xf32> to vector<16x128xf32>
    %7 = arith.addf %4, %6 : vector<16x128xf32>
    %8 = vector.extract_strided_slice %3 {offsets = [0, 128], sizes = [16, 128], strides = [1, 1]} : vector<16x256xf32> to vector<16x128xf32>
    %c0_4 = arith.constant 0 : index
    %c0_5 = arith.constant 0 : index
    %9 = vector.load %arg5[%c0_4, %c0_5] : memref<17x128xf32, #tpu.memory_space<vmem>>, vector<1x128xf32>
    %10 = vector.broadcast %9 : vector<1x128xf32> to vector<16x128xf32>
    %11 = arith.addf %8, %10 : vector<16x128xf32>
    %c7 = arith.constant 7 : index
    %c0_6 = arith.constant 0 : index
    %12 = vector.load %arg5[%c7, %c0_6] : memref<17x128xf32, #tpu.memory_space<vmem>>, vector<1x128xf32>
    %c8 = arith.constant 8 : index
    %c0_7 = arith.constant 0 : index
    %13 = vector.load %arg5[%c8, %c0_7] : memref<17x128xf32, #tpu.memory_space<vmem>>, vector<1x128xf32>
    %cst_8 = arith.constant dense<0.000000e+00> : vector<128xf32>
    %14 = vector.multi_reduction <add>, %7, %cst_8 [0] : vector<16x128xf32> to vector<128xf32>
    %15 = vector.shape_cast %14 : vector<128xf32> to vector<1x128xf32>
    %cst_9 = arith.constant 1.600000e+01 : f32
    %16 = vector.broadcast %cst_9 : f32 to vector<1x128xf32>
    %17 = arith.divf %15, %16 : vector<1x128xf32>
    %18 = arith.mulf %7, %7 : vector<16x128xf32>
    %cst_10 = arith.constant dense<0.000000e+00> : vector<128xf32>
    %19 = vector.multi_reduction <add>, %18, %cst_10 [0] : vector<16x128xf32> to vector<128xf32>
    %20 = vector.shape_cast %19 : vector<128xf32> to vector<1x128xf32>
    %cst_11 = arith.constant 1.600000e+01 : f32
    %21 = vector.broadcast %cst_11 : f32 to vector<1x128xf32>
    %22 = arith.divf %20, %21 : vector<1x128xf32>
    %23 = arith.mulf %17, %17 : vector<1x128xf32>
    %24 = arith.subf %22, %23 : vector<1x128xf32>
    %cst_12 = arith.constant 9.99999974E-6 : f32
    %25 = vector.broadcast %cst_12 : f32 to vector<1x128xf32>
    %26 = arith.addf %24, %25 : vector<1x128xf32>
    %27 = math.rsqrt %26 : vector<1x128xf32>
    %28 = arith.mulf %12, %27 : vector<1x128xf32>
    %29 = arith.mulf %17, %28 : vector<1x128xf32>
    %30 = arith.subf %13, %29 : vector<1x128xf32>
    %31 = vector.broadcast %28 : vector<1x128xf32> to vector<16x128xf32>
    %32 = arith.mulf %7, %31 : vector<16x128xf32>
    %33 = vector.broadcast %30 : vector<1x128xf32> to vector<16x128xf32>
    %34 = arith.addf %32, %33 : vector<16x128xf32>
    %cst_13 = arith.constant 0.000000e+00 : f32
    %35 = vector.broadcast %cst_13 : f32 to vector<16x128xf32>
    %36 = arith.maximumf %34, %35 : vector<16x128xf32>
    %c1 = arith.constant 1 : index
    %c0_14 = arith.constant 0 : index
    %37 = vector.load %arg5[%c1, %c0_14] : memref<17x128xf32, #tpu.memory_space<vmem>>, vector<1x128xf32>
    %c2 = arith.constant 2 : index
    %c0_15 = arith.constant 0 : index
    %38 = vector.load %arg5[%c2, %c0_15] : memref<17x128xf32, #tpu.memory_space<vmem>>, vector<1x128xf32>
    %cst_16 = arith.constant dense<0.000000e+00> : vector<128xf32>
    %39 = vector.multi_reduction <add>, %11, %cst_16 [0] : vector<16x128xf32> to vector<128xf32>
    %40 = vector.shape_cast %39 : vector<128xf32> to vector<1x128xf32>
    %cst_17 = arith.constant 1.600000e+01 : f32
    %41 = vector.broadcast %cst_17 : f32 to vector<1x128xf32>
    %42 = arith.divf %40, %41 : vector<1x128xf32>
    %43 = arith.mulf %11, %11 : vector<16x128xf32>
    %cst_18 = arith.constant dense<0.000000e+00> : vector<128xf32>
    %44 = vector.multi_reduction <add>, %43, %cst_18 [0] : vector<16x128xf32> to vector<128xf32>
    %45 = vector.shape_cast %44 : vector<128xf32> to vector<1x128xf32>
    %cst_19 = arith.constant 1.600000e+01 : f32
    %46 = vector.broadcast %cst_19 : f32 to vector<1x128xf32>
    %47 = arith.divf %45, %46 : vector<1x128xf32>
    %48 = arith.mulf %42, %42 : vector<1x128xf32>
    %49 = arith.subf %47, %48 : vector<1x128xf32>
    %cst_20 = arith.constant 9.99999974E-6 : f32
    %50 = vector.broadcast %cst_20 : f32 to vector<1x128xf32>
    %51 = arith.addf %49, %50 : vector<1x128xf32>
    %52 = math.rsqrt %51 : vector<1x128xf32>
    %53 = arith.mulf %37, %52 : vector<1x128xf32>
    %54 = arith.mulf %42, %53 : vector<1x128xf32>
    %55 = arith.subf %38, %54 : vector<1x128xf32>
    %56 = vector.broadcast %53 : vector<1x128xf32> to vector<16x128xf32>
    %57 = arith.mulf %11, %56 : vector<16x128xf32>
    %58 = vector.broadcast %55 : vector<1x128xf32> to vector<16x128xf32>
    %59 = arith.addf %57, %58 : vector<16x128xf32>
    %cst_21 = arith.constant 0.000000e+00 : f32
    %60 = vector.broadcast %cst_21 : f32 to vector<16x128xf32>
    %61 = arith.maximumf %59, %60 : vector<16x128xf32>
    %62 = vector.extract_strided_slice %61 {offsets = [0, 0], sizes = [16, 32], strides = [1, 1]} : vector<16x128xf32> to vector<16x32xf32>
    %c0_22 = arith.constant 0 : index
    %c0_23 = arith.constant 0 : index
    %63 = vector.load %arg4[%c0_22, %c0_23] : memref<736x128xbf16, #tpu.memory_space<vmem>>, vector<32x128xbf16>
    %64 = arith.extf %63 : vector<32x128xbf16> to vector<32x128xf32>
    %cst_24 = arith.constant dense<0.000000e+00> : vector<16x128xf32>
    %65 = tpu.matmul %62, %64, %cst_24 {dimension_numbers = #tpu.dot_dimension_numbers<[1], [0], [0], [1], [0, 0, 1, 1], [], []>} : vector<16x32xf32>, vector<32x128xf32>, vector<16x128xf32> -> vector<16x128xf32>
    %c3 = arith.constant 3 : index
    %c0_25 = arith.constant 0 : index
    %66 = vector.load %arg5[%c3, %c0_25] : memref<17x128xf32, #tpu.memory_space<vmem>>, vector<1x128xf32>
    %67 = vector.broadcast %66 : vector<1x128xf32> to vector<16x128xf32>
    %68 = arith.addf %65, %67 : vector<16x128xf32>
    %c4 = arith.constant 4 : index
    %c0_26 = arith.constant 0 : index
    %69 = vector.load %arg5[%c4, %c0_26] : memref<17x128xf32, #tpu.memory_space<vmem>>, vector<1x128xf32>
    %c5 = arith.constant 5 : index
    %c0_27 = arith.constant 0 : index
    %70 = vector.load %arg5[%c5, %c0_27] : memref<17x128xf32, #tpu.memory_space<vmem>>, vector<1x128xf32>
    %cst_28 = arith.constant dense<0.000000e+00> : vector<128xf32>
    %71 = vector.multi_reduction <add>, %68, %cst_28 [0] : vector<16x128xf32> to vector<128xf32>
    %72 = vector.shape_cast %71 : vector<128xf32> to vector<1x128xf32>
    %cst_29 = arith.constant 1.600000e+01 : f32
    %73 = vector.broadcast %cst_29 : f32 to vector<1x128xf32>
    %74 = arith.divf %72, %73 : vector<1x128xf32>
    %75 = arith.mulf %68, %68 : vector<16x128xf32>
    %cst_30 = arith.constant dense<0.000000e+00> : vector<128xf32>
    %76 = vector.multi_reduction <add>, %75, %cst_30 [0] : vector<16x128xf32> to vector<128xf32>
    %77 = vector.shape_cast %76 : vector<128xf32> to vector<1x128xf32>
    %cst_31 = arith.constant 1.600000e+01 : f32
    %78 = vector.broadcast %cst_31 : f32 to vector<1x128xf32>
    %79 = arith.divf %77, %78 : vector<1x128xf32>
    %80 = arith.mulf %74, %74 : vector<1x128xf32>
    %81 = arith.subf %79, %80 : vector<1x128xf32>
    %cst_32 = arith.constant 9.99999974E-6 : f32
    %82 = vector.broadcast %cst_32 : f32 to vector<1x128xf32>
    %83 = arith.addf %81, %82 : vector<1x128xf32>
    %84 = math.rsqrt %83 : vector<1x128xf32>
    %85 = arith.mulf %69, %84 : vector<1x128xf32>
    %86 = arith.mulf %74, %85 : vector<1x128xf32>
    %87 = arith.subf %70, %86 : vector<1x128xf32>
    %88 = vector.broadcast %85 : vector<1x128xf32> to vector<16x128xf32>
    %89 = arith.mulf %68, %88 : vector<16x128xf32>
    %90 = vector.broadcast %87 : vector<1x128xf32> to vector<16x128xf32>
    %91 = arith.addf %89, %90 : vector<16x128xf32>
    %cst_33 = arith.constant 0.000000e+00 : f32
    %92 = vector.broadcast %cst_33 : f32 to vector<16x128xf32>
    %93 = arith.maximumf %91, %92 : vector<16x128xf32>
    %c32 = arith.constant 32 : index
    %c0_34 = arith.constant 0 : index
    %94 = vector.load %arg4[%c32, %c0_34] : memref<736x128xbf16, #tpu.memory_space<vmem>>, vector<128x128xbf16>
    %95 = arith.extf %94 : vector<128x128xbf16> to vector<128x128xf32>
    %cst_35 = arith.constant dense<0.000000e+00> : vector<16x128xf32>
    %96 = tpu.matmul %36, %95, %cst_35 {dimension_numbers = #tpu.dot_dimension_numbers<[1], [0], [0], [1], [0, 0, 1, 1], [], []>} : vector<16x128xf32>, vector<128x128xf32>, vector<16x128xf32> -> vector<16x128xf32>
    %c9 = arith.constant 9 : index
    %c0_36 = arith.constant 0 : index
    %97 = vector.load %arg5[%c9, %c0_36] : memref<17x128xf32, #tpu.memory_space<vmem>>, vector<1x128xf32>
    %98 = vector.broadcast %97 : vector<1x128xf32> to vector<16x128xf32>
    %99 = arith.addf %96, %98 : vector<16x128xf32>
    %c10 = arith.constant 10 : index
    %c0_37 = arith.constant 0 : index
    %100 = vector.load %arg5[%c10, %c0_37] : memref<17x128xf32, #tpu.memory_space<vmem>>, vector<1x128xf32>
    %c11 = arith.constant 11 : index
    %c0_38 = arith.constant 0 : index
    %101 = vector.load %arg5[%c11, %c0_38] : memref<17x128xf32, #tpu.memory_space<vmem>>, vector<1x128xf32>
    %cst_39 = arith.constant dense<0.000000e+00> : vector<128xf32>
    %102 = vector.multi_reduction <add>, %99, %cst_39 [0] : vector<16x128xf32> to vector<128xf32>
    %103 = vector.shape_cast %102 : vector<128xf32> to vector<1x128xf32>
    %cst_40 = arith.constant 1.600000e+01 : f32
    %104 = vector.broadcast %cst_40 : f32 to vector<1x128xf32>
    %105 = arith.divf %103, %104 : vector<1x128xf32>
    %106 = arith.mulf %99, %99 : vector<16x128xf32>
    %cst_41 = arith.constant dense<0.000000e+00> : vector<128xf32>
    %107 = vector.multi_reduction <add>, %106, %cst_41 [0] : vector<16x128xf32> to vector<128xf32>
    %108 = vector.shape_cast %107 : vector<128xf32> to vector<1x128xf32>
    %cst_42 = arith.constant 1.600000e+01 : f32
    %109 = vector.broadcast %cst_42 : f32 to vector<1x128xf32>
    %110 = arith.divf %108, %109 : vector<1x128xf32>
    %111 = arith.mulf %105, %105 : vector<1x128xf32>
    %112 = arith.subf %110, %111 : vector<1x128xf32>
    %cst_43 = arith.constant 9.99999974E-6 : f32
    %113 = vector.broadcast %cst_43 : f32 to vector<1x128xf32>
    %114 = arith.addf %112, %113 : vector<1x128xf32>
    %115 = math.rsqrt %114 : vector<1x128xf32>
    %116 = arith.mulf %100, %115 : vector<1x128xf32>
    %117 = arith.mulf %105, %116 : vector<1x128xf32>
    %118 = arith.subf %101, %117 : vector<1x128xf32>
    %119 = vector.broadcast %116 : vector<1x128xf32> to vector<16x128xf32>
    %120 = arith.mulf %99, %119 : vector<16x128xf32>
    %121 = vector.broadcast %118 : vector<1x128xf32> to vector<16x128xf32>
    %122 = arith.addf %120, %121 : vector<16x128xf32>
    %cst_44 = arith.constant 0.000000e+00 : f32
    %123 = vector.broadcast %cst_44 : f32 to vector<16x128xf32>
    %124 = arith.maximumf %122, %123 : vector<16x128xf32>
    %c160 = arith.constant 160 : index
    %c0_45 = arith.constant 0 : index
    %125 = vector.load %arg4[%c160, %c0_45] : memref<736x128xbf16, #tpu.memory_space<vmem>>, vector<128x128xbf16>
    %126 = arith.extf %125 : vector<128x128xbf16> to vector<128x128xf32>
    %cst_46 = arith.constant dense<0.000000e+00> : vector<16x128xf32>
    %127 = tpu.matmul %124, %126, %cst_46 {dimension_numbers = #tpu.dot_dimension_numbers<[1], [0], [0], [1], [0, 0, 1, 1], [], []>} : vector<16x128xf32>, vector<128x128xf32>, vector<16x128xf32> -> vector<16x128xf32>
    %128 = arith.mulf %127, %93 : vector<16x128xf32>
    %c288 = arith.constant 288 : index
    %c0_47 = arith.constant 0 : index
    %129 = vector.load %arg4[%c288, %c0_47] : memref<736x128xbf16, #tpu.memory_space<vmem>>, vector<128x128xbf16>
    %130 = arith.extf %129 : vector<128x128xbf16> to vector<128x128xf32>
    %cst_48 = arith.constant dense<0.000000e+00> : vector<16x128xf32>
    %131 = tpu.matmul %128, %130, %cst_48 {dimension_numbers = #tpu.dot_dimension_numbers<[1], [0], [0], [1], [0, 0, 1, 1], [], []>} : vector<16x128xf32>, vector<128x128xf32>, vector<16x128xf32> -> vector<16x128xf32>
    %c12 = arith.constant 12 : index
    %c0_49 = arith.constant 0 : index
    %132 = vector.load %arg5[%c12, %c0_49] : memref<17x128xf32, #tpu.memory_space<vmem>>, vector<1x128xf32>
    %133 = vector.broadcast %132 : vector<1x128xf32> to vector<16x128xf32>
    %134 = arith.addf %131, %133 : vector<16x128xf32>
    %135 = arith.negf %134 : vector<16x128xf32>
    %136 = math.exp %135 : vector<16x128xf32>
    %cst_50 = arith.constant 1.000000e+00 : f32
    %137 = vector.broadcast %cst_50 : f32 to vector<16x128xf32>
    %138 = arith.addf %137, %136 : vector<16x128xf32>
    %139 = arith.divf %137, %138 : vector<16x128xf32>
    %140 = vector.extract_strided_slice %139 {offsets = [0, 0], sizes = [16, 64], strides = [1, 1]} : vector<16x128xf32> to vector<16x64xf32>
    %c416 = arith.constant 416 : index
    %c0_51 = arith.constant 0 : index
    %141 = vector.load %arg4[%c416, %c0_51] : memref<736x128xbf16, #tpu.memory_space<vmem>>, vector<64x128xbf16>
    %142 = arith.extf %141 : vector<64x128xbf16> to vector<64x128xf32>
    %cst_52 = arith.constant dense<0.000000e+00> : vector<16x128xf32>
    %143 = tpu.matmul %140, %142, %cst_52 {dimension_numbers = #tpu.dot_dimension_numbers<[1], [0], [0], [1], [0, 0, 1, 1], [], []>} : vector<16x64xf32>, vector<64x128xf32>, vector<16x128xf32> -> vector<16x128xf32>
    %144 = arith.mulf %143, %93 : vector<16x128xf32>
    %c480 = arith.constant 480 : index
    %c0_53 = arith.constant 0 : index
    %145 = vector.load %arg4[%c480, %c0_53] : memref<736x128xbf16, #tpu.memory_space<vmem>>, vector<128x128xbf16>
    %146 = arith.extf %145 : vector<128x128xbf16> to vector<128x128xf32>
    %cst_54 = arith.constant dense<0.000000e+00> : vector<16x128xf32>
    %147 = tpu.matmul %144, %146, %cst_54 {dimension_numbers = #tpu.dot_dimension_numbers<[1], [0], [0], [1], [0, 0, 1, 1], [], []>} : vector<16x128xf32>, vector<128x128xf32>, vector<16x128xf32> -> vector<16x128xf32>
    %c13 = arith.constant 13 : index
    %c0_55 = arith.constant 0 : index
    %148 = vector.load %arg5[%c13, %c0_55] : memref<17x128xf32, #tpu.memory_space<vmem>>, vector<1x128xf32>
    %149 = vector.broadcast %148 : vector<1x128xf32> to vector<16x128xf32>
    %150 = arith.addf %147, %149 : vector<16x128xf32>
    %cst_56 = arith.constant dense<0.000000e+00> : vector<128xf32>
    %151 = vector.multi_reduction <add>, %150, %cst_56 [0] : vector<16x128xf32> to vector<128xf32>
    %152 = vector.shape_cast %151 : vector<128xf32> to vector<1x128xf32>
    %cst_57 = arith.constant 1.600000e+01 : f32
    %153 = vector.broadcast %cst_57 : f32 to vector<1x128xf32>
    %154 = arith.divf %152, %153 : vector<1x128xf32>
    %155 = arith.mulf %150, %150 : vector<16x128xf32>
    %cst_58 = arith.constant dense<0.000000e+00> : vector<128xf32>
    %156 = vector.multi_reduction <add>, %155, %cst_58 [0] : vector<16x128xf32> to vector<128xf32>
    %157 = vector.shape_cast %156 : vector<128xf32> to vector<1x128xf32>
    %cst_59 = arith.constant 1.600000e+01 : f32
    %158 = vector.broadcast %cst_59 : f32 to vector<1x128xf32>
    %159 = arith.divf %157, %158 : vector<1x128xf32>
    %160 = arith.mulf %154, %154 : vector<1x128xf32>
    %161 = arith.subf %159, %160 : vector<1x128xf32>
    %cst_60 = arith.constant 1.06666672 : f32
    %162 = vector.broadcast %cst_60 : f32 to vector<1x128xf32>
    %163 = arith.mulf %161, %162 : vector<1x128xf32>
    %c14 = arith.constant 14 : index
    %c0_61 = arith.constant 0 : index
    %164 = vector.load %arg5[%c14, %c0_61] : memref<17x128xf32, #tpu.memory_space<vmem>>, vector<1x128xf32>
    %cst_62 = arith.constant 9.99999974E-6 : f32
    %165 = vector.broadcast %cst_62 : f32 to vector<1x128xf32>
    %166 = arith.addf %163, %165 : vector<1x128xf32>
    %167 = math.rsqrt %166 : vector<1x128xf32>
    %168 = arith.mulf %164, %167 : vector<1x128xf32>
    %169 = vector.broadcast %168 : vector<1x128xf32> to vector<16x128xf32>
    %170 = arith.mulf %150, %169 : vector<16x128xf32>
    %c15 = arith.constant 15 : index
    %c0_63 = arith.constant 0 : index
    %171 = vector.load %arg5[%c15, %c0_63] : memref<17x128xf32, #tpu.memory_space<vmem>>, vector<1x128xf32>
    %172 = arith.mulf %154, %168 : vector<1x128xf32>
    %173 = arith.subf %171, %172 : vector<1x128xf32>
    %174 = vector.broadcast %173 : vector<1x128xf32> to vector<16x128xf32>
    %175 = arith.addf %170, %174 : vector<16x128xf32>
    %176 = arith.addf %175, %124 : vector<16x128xf32>
    %c608 = arith.constant 608 : index
    %c0_64 = arith.constant 0 : index
    %177 = vector.load %arg4[%c608, %c0_64] : memref<736x128xbf16, #tpu.memory_space<vmem>>, vector<128x128xbf16>
    %178 = arith.extf %177 : vector<128x128xbf16> to vector<128x128xf32>
    %cst_65 = arith.constant dense<0.000000e+00> : vector<16x128xf32>
    %179 = tpu.matmul %176, %178, %cst_65 {dimension_numbers = #tpu.dot_dimension_numbers<[1], [0], [0], [1], [0, 0, 1, 1], [], []>} : vector<16x128xf32>, vector<128x128xf32>, vector<16x128xf32> -> vector<16x128xf32>
    %c16 = arith.constant 16 : index
    %c0_66 = arith.constant 0 : index
    %180 = vector.load %arg5[%c16, %c0_66] : memref<17x128xf32, #tpu.memory_space<vmem>>, vector<1x128xf32>
    %181 = vector.broadcast %180 : vector<1x128xf32> to vector<16x128xf32>
    %182 = arith.addf %179, %181 : vector<16x128xf32>
    %183 = arith.negf %182 : vector<16x128xf32>
    %184 = math.exp %183 : vector<16x128xf32>
    %cst_67 = arith.constant 1.000000e+00 : f32
    %185 = vector.broadcast %cst_67 : f32 to vector<16x128xf32>
    %186 = arith.addf %185, %184 : vector<16x128xf32>
    %187 = arith.divf %185, %186 : vector<16x128xf32>
    %c0_68 = arith.constant 0 : index
    %c0_69 = arith.constant 0 : index
    %188 = vector.load %arg2[%c0_68, %c0_69] : memref<16x1xi32, #tpu.memory_space<vmem>>, vector<16x1xi32>
    %189 = tpu.iota {dimensions = array<i32: 1>} : vector<16x128xi32>
    %c0_i32 = arith.constant 0 : i32
    %190 = vector.broadcast %c0_i32 : i32 to vector<16x1xi32>
    %191 = arith.cmpi sge, %188, %190 : vector<16x1xi32>
    %c2_i32 = arith.constant 2 : i32
    %192 = vector.broadcast %c2_i32 : i32 to vector<16x1xi32>
    %193 = arith.cmpi slt, %188, %192 : vector<16x1xi32>
    %194 = arith.andi %191, %193 : vector<16x1xi1>
    %195 = vector.broadcast %188 : vector<16x1xi32> to vector<16x128xi32>
    %196 = arith.cmpi eq, %189, %195 : vector<16x128xi32>
    %197 = vector.broadcast %194 : vector<16x1xi1> to vector<16x128xi1>
    %198 = arith.andi %196, %197 : vector<16x128xi1>
    %cst_70 = arith.constant 0.000000e+00 : f32
    %199 = vector.broadcast %cst_70 : f32 to vector<16x128xf32>
    %200 = arith.select %198, %187, %199 : vector<16x128xi1>, vector<16x128xf32>
    %cst_71 = arith.constant dense<0.000000e+00> : vector<16xf32>
    %201 = vector.multi_reduction <add>, %200, %cst_71 [1] : vector<16x128xf32> to vector<16xf32>
    %202 = vector.shape_cast %201 : vector<16xf32> to vector<16x1xf32>
    %c0_72 = arith.constant 0 : index
    %c0_73 = arith.constant 0 : index
    %203 = vector.load %arg6[%c0_72, %c0_73] : memref<16x1xf32, #tpu.memory_space<vmem>>, vector<16x1xf32>
    tpu.vector_store %arg6[%c0_72, %c0_73], %202 {strides = array<i32>} : memref<16x1xf32, #tpu.memory_space<vmem>>, vector<16x1xf32>,
    return
  }
  func.func @transform_0(%arg0: i32) -> (i32, i32) {
    %c0_i32 = arith.constant 0 : i32
    %c0_i32_0 = arith.constant 0 : i32
    return %arg0, %c0_i32 : i32, i32
  }
  func.func @transform_1(%arg0: i32) -> (i32, i32) {
    %c0_i32 = arith.constant 0 : i32
    %c0_i32_0 = arith.constant 0 : i32
    return %arg0, %c0_i32 : i32, i32
  }
  func.func @transform_2(%arg0: i32) -> (i32, i32) {
    %c0_i32 = arith.constant 0 : i32
    %c0_i32_0 = arith.constant 0 : i32
    %c0_i32_1 = arith.constant 0 : i32
    return %c0_i32, %c0_i32_0 : i32, i32
  }
  func.func @transform_3(%arg0: i32) -> (i32, i32) {
    %c0_i32 = arith.constant 0 : i32
    %c0_i32_0 = arith.constant 0 : i32
    %c0_i32_1 = arith.constant 0 : i32
    return %c0_i32, %c0_i32_0 : i32, i32
  }
  func.func @transform_4(%arg0: i32) -> (i32, i32) {
    %c0_i32 = arith.constant 0 : i32
    %c0_i32_0 = arith.constant 0 : i32
    %c0_i32_1 = arith.constant 0 : i32
    return %c0_i32, %c0_i32_0 : i32, i32
  }
  func.func @transform_5(%arg0: i32) -> (i32, i32) {
    %c0_i32 = arith.constant 0 : i32
    %c0_i32_0 = arith.constant 0 : i32
    return %arg0, %c0_i32 : i32, i32
  }
}

</mosaic_0001>

<bundles_post_ra>
// kernel: tpu_custom_call.1
= control target key start
LH: loop header
LB: loop body
LE: loop exit
PB: predicated region body
PF: predicated region fallthrough
CT: control target
= control target key end

     0   :  { %10 = vsyncpa [#allocation3], 0  ;;  %s1530_s18 = smov 0   ;;  %s1717_s0 = inlined_call_operand.vmem [shape: f32[128,32], index: 0, kind: input, shape index: {}]   ;;  %s1718_s1 = inlined_call_operand.vmem [shape: s32[128,1], index: 1, kind: input, shape index: {}]   ;;  %s1719_s2 = inlined_call_operand.vmem [shape: bf16[32,256], index: 2, kind: input, shape index: {}]   ;;  %s1720_s3 = inlined_call_operand.hbm [shape: bf16[736,128], index: 3, kind: input, shape index: {}]   ;;  %s1721_s4 = inlined_call_operand.vmem [shape: f32[17,128], index: 4, kind: input, shape index: {}]   ;;  %s1722_s5 = inlined_call_operand.vmem [shape: f32[128,1], index: 5, kind: output, shape index: {}]  }
   0x1 LB: > { %s176_s21 = sshll.u32 %s1720_s3, 4  ;;  %s1137_s22 = sadd.s32 4294967295, %s1493_s18   ;;  %s1493_s18 = sphi %s1530_s18, %s16_s18   ;;  %s177_s21 = int_to_ptr.hbm [resolvable:$true] %s176_s21 }
   0x2   : > { %p1139_p0 = scmp.ge.s32.totalorder %s1493_s18, 1  ;;  %p162_p1 = scmp.lt.s32.totalorder %s1493_s18, 9 }
   0x3   : > { %p1401_p2 = scmp.eq.s32.totalorder %s1137_s22, 0  ;;  %s1495_s23 = smov [#allocation2]  }
   0x4   : > { %p163_p3 = pnand %p1139_p0, %p162_p1  ;;  %s178_s24 = sshll.u32 %s1495_s23, 4  ;;  %s179_s24 = int_to_ptr.vmem [resolvable:$true] %s178_s24 }
   0x5   : > { %s1496_s25 = smov 64   ;;  %s1497_s26 = smov 4  }
   0x6   : > { %p1397_p4 = pneg %p163_p3  ;;  %215 = sbr.rel (%p163_p3) target bundleno = 1307 (0x51b), region = 40 }
   0x8   : > { %p1398_p5 = pnand %p1401_p2, %p1397_p4 }
   0xa   : > { %1400 = dma.hbm_to_vmem [thread:$0]  (!%p1398_p5), %s177_s21, 5888, %s179_s24, [#allocation3], %s1496_s25, %s1496_s25, %s1497_s26  }
   0xb   : > { %1488 = dma.done.wait (%p1401_p2), [#allocation3], 5888  }
   0xc   : > { %1490 = vsyncadd (%p1401_p2), [#allocation3], 4294961408  ;;  %s1144_s27 = sshll.u32 %s1137_s22, 1  ;;  %v272_v0 = vld [vmem:[%s1719_s2 + $0x18] sm:$0xff]  ;;  %v271_v1 = vld [vmem:[%s1719_s2 + $0x10] sm:$0xff]  ;;  %vm281_vm0 = vcmask 261120  }
   0xd   : > { %p250_p6 = scmp.lt.s32.totalorder %s1144_s27, 15  ;;  %v270_v2 = vld [vmem:[%s1719_s2 + $0x8] sm:$0xff]  ;;  %v279_v3 = vunpack.c.l.bf16 %v272_v0  ;;  %v277_v4 = vunpack.c.l.bf16 %v271_v1  ;;  %v269_v5 = vld [vmem:[%s1719_s2] sm:$0xff]  ;;  %v280_v6 = vunpack.c.h.bf16 %v272_v0  ;;  %v278_v7 = vunpack.c.h.bf16 %v271_v1  ;;  %v1354_v27 = vld [vmem:[#allocation2 + $0x38] sm:$0xff]  }
   0xe   : > { %v275_v8 = vunpack.c.l.bf16 %v270_v2  ;;  %v276_v9 = vunpack.c.h.bf16 %v270_v2  ;;  %v273_v10 = vunpack.c.l.bf16 %v269_v5  ;;  %v274_v11 = vunpack.c.h.bf16 %v269_v5  ;;  %v1356_v15 = vld [vmem:[#allocation2 + $0x48] sm:$0xff]   ;;  %v1419_v20 = vld [vmem:[%s1721_s4] ss:$0 sm:$0xff]  ;;  %v1418_v22 = vld [vmem:[%s1721_s4 + $0x6] ss:$0 sm:$0xff] }
   0xf   : > { %s1724_s27 = smov (!%p250_p6, %s1144_s27), 15  ;;  %300 = vmatpush.msra.mxu0 %v279_v3  ;;  %323 = vmatpush.msra.mxu1 %v280_v6  ;;  %v1498_v14 = vmov 16.0   ;;  %v1203_v16 = vunpack.c.h.bf16 %v1356_v15  ;;  %v1202_v19 = vunpack.c.l.bf16 %v1356_v15  ;;  %v1355_v21 = vld [vmem:[#allocation2 + $0x40] sm:$0xff]   ;;  %v1195_v30 = vunpack.c.h.bf16 %v1354_v27  ;;  %v1353_v37 = vld [vmem:[#allocation2 + $0x30] sm:$0xff]   ;;  %v1352_v50 = vld [vmem:[#allocation2 + $0x28] sm:$0xff]  }
  0x10   : > { %s1553_s11 = sshll.u32 %s1724_s27, 3  ;;  %1425 = vrcp.f32 %v1498_v14  ;;  %v1199_v23 = vunpack.c.h.bf16 %v1355_v21  ;;  %v1198_v25 = vunpack.c.l.bf16 %v1355_v21  ;;  %v1194_v33 = vunpack.c.l.bf16 %v1354_v27  ;;  %v1351_v62 = vld [vmem:[#allocation2 + $0x20] sm:$0xff]  }
  0x11   : > { %s253_s14 = scalar_lea.vmem %s1717_s0, %s1553_s11  ;;  %301 = vmatpush.msra.mxu0 %v277_v4  ;;  %324 = vmatpush.msra.mxu1 %v278_v7  ;;  %v1191_v40 = vunpack.c.h.bf16 %v1353_v37  ;;  %v1190_v45 = vunpack.c.l.bf16 %v1353_v37  ;;  %v1187_v52 = vunpack.c.h.bf16 %v1352_v50  ;;  %v1186_v57 = vunpack.c.l.bf16 %v1352_v50  ;;  %s259_s23 = scalar_lea.vmem %s1718_s1, %s1553_s11 }
  0x12   : > { %v267_v12 = vld [vmem:[%s253_s14] sm:$0xff]  ;;  %v268_v13 = vld [vmem:[%s253_s14 + $0x8] sm:$0xff]  ;;  %554 = vmatpush.msra.mxu3 %v1203_v16  ;;  %v1183_v0 = vunpack.c.h.bf16 %v1351_v62  ;;  %v1182_v5 = vunpack.c.l.bf16 %v1351_v62  ;;  %s265_s7 = scalar_lea.vmem %s1722_s5, %s1553_s11 }
  0x13   : > { %302 = vmatpush.msra.mxu0 %v275_v8  ;;  %325 = vmatpush.msra.mxu1 %v276_v9 }
  0x14   : > { %555 = vmatpush.msra.mxu3 %v1202_v19 }
  0x15   : > { %303 = vmatpush.msra.mxu0 %v273_v10  ;;  %326 = vmatpush.msra.mxu1 %v274_v11  ;;  %v1350_v10 = vld [vmem:[#allocation2 + $0x18] sm:$0xff]  }
  0x16   : > { %1150 = vmatmul.msk.f32.vlgmr.msra.gmra.mxu0 %vm281_vm0, %v267_v12  ;;  %1152 = vmatmul.msk.f32.vlgmr.msra.gmra.mxu1 %vm281_vm0, %v267_v12  ;;  %v1426_v24 = vpop.eup %1425  ;;  %v1179_v12 = vunpack.c.h.bf16 %v1350_v10  ;;  %v1178_v16 = vunpack.c.l.bf16 %v1350_v10 }
  0x17   : > { %556 = vmatpush.msra.mxu3 %v1199_v23  ;;  %v352_v29 = vmul.f32 16.0, %v1426_v24  ;;  %vm356_vm1 = vweird.f32 %v1426_v24 }
  0x19   : > { %557 = vmatpush.msra.mxu3 %v1198_v25  ;;  %v353_v39 = vsub.f32 1.0, %v352_v29 }
  0x1b   : > { %558 = vmatpush.msra.mxu3 %v1195_v30  ;;  %v354_v51 = vmul.f32 %v1426_v24, %v353_v39 }
  0x1d   : > { %559 = vmatpush.msra.mxu3 %v1194_v33  ;;  %v355_v63 = vadd.f32 %v1426_v24, %v354_v51 }
  0x1e   : > { %1151 = vmatmul.msk.f32.gmra.mxu0 %vm281_vm0, %v268_v13  ;;  %1153 = vmatmul.msk.f32.gmra.mxu1 %vm281_vm0, %v268_v13 }
  0x1f   : > { %560 = vmatpush.msra.mxu3 %v1191_v40  ;;  %v1589_v11 = vsel %vm356_vm1, %v1426_v24, %v355_v63  ;;  %v1348_v40 = vld [vmem:[#allocation2 + $0x8] sm:$0xff]   ;;  %vm789_vm1 = vcmask 523264  }
  0x20   : > { %v343_v63 = vld [vmem:[%s1721_s4 + $0x8] sm:$0x1] }
  0x21   : > { %561 = vmatpush.msra.mxu3 %v1190_v45 }
  0x23   : > { %562 = vmatpush.msra.mxu3 %v1187_v52 }
  0x25   : > { %563 = vmatpush.msra.mxu3 %v1186_v57 }
  0x27   : > { %564 = vmatpush.msra.mxu3 %v1183_v0 }
  0x29   : > { %565 = vmatpush.msra.mxu3 %v1182_v5 }
  0x2b   : > { %566 = vmatpush.msra.mxu3 %v1179_v12 }
  0x2d   : > { %567 = vmatpush.msra.mxu3 %v1178_v16 }
  0x93   : > { %v305_v17 = vpop.f32.mrf.mxu0  ;;  %v328_v18 = vpop.f32.mrf.mxu1 }
  0x94   : > { %v1569_v26 = vadd.f32 %v1419_v20, %v328_v18  ;;  %v1571_v28 = vadd.f32 %v1418_v22, %v305_v17  ;;  %v1349_v17 = vld [vmem:[#allocation2 + $0x10] sm:$0xff]  }
  0x95   : > { %v1175_v18 = vunpack.c.h.bf16 %v1349_v17  ;;  %v1174_v23 = vunpack.c.l.bf16 %v1349_v17 }
  0x96   : > { %v403_v35 = vmul.f32 %v1569_v26, %v1569_v26  ;;  %v359_v38 = vmul.f32 %v1571_v28, %v1571_v28 }
  0x97   : > { %568 = vmatpush.msra.mxu3 %v1175_v18 }
  0x99   : > { %569 = vmatpush.msra.mxu3 %v1174_v23 }
  0x9b   : > { %v308_v31 = vpop.f32.mrf.mxu0  ;;  %v331_v32 = vpop.f32.mrf.mxu1 }
  0x9c   : > { %v1573_v34 = vadd.f32 %v1418_v22, %v308_v31  ;;  %v1577_v36 = vadd.f32 %v1419_v20, %v331_v32 }
  0x9e   : > { %v344_v41 = vadd.f32 %v1573_v34, %v1571_v28  ;;  %v360_v42 = vmul.f32 %v1573_v34, %v1573_v34  ;;  %v395_v43 = vadd.f32 %v1577_v36, %v1569_v26  ;;  %v404_v44 = vmul.f32 %v1577_v36, %v1577_v36 }
  0xa0   : > { %v345_v46 = vrot.slane %v344_v41, 4  ;;  %v361_v47 = vadd.f32 %v360_v42, %v359_v38  ;;  %v396_v48 = vrot.slane %v395_v43, 4  ;;  %v405_v49 = vadd.f32 %v404_v44, %v403_v35 }
  0xa1   : > { %v1170_v44 = vunpack.c.l.bf16 %v1348_v40 }
  0xa2   : > { %v346_v53 = vadd.f32 %v345_v46, %v344_v41  ;;  %v362_v54 = vrot.slane %v361_v47, 4  ;;  %v397_v55 = vadd.f32 %v396_v48, %v395_v43  ;;  %v406_v56 = vrot.slane %v405_v49, 4  ;;  %v1165_v41 = vld [vmem:[#allocation2] sm:$0xff]  }
  0xa3   : > { %v1171_v43 = vunpack.c.h.bf16 %v1348_v40  ;;  %v1166_v50 = vunpack.c.l.bf16 %v1165_v41 }
  0xa4   : > { %v347_v58 = vrot.slane %v346_v53, 2  ;;  %v363_v59 = vadd.f32 %v362_v54, %v361_v47  ;;  %v398_v60 = vrot.slane %v397_v55, 2  ;;  %v407_v61 = vadd.f32 %v406_v56, %v405_v49 }
  0xa5   : > { %465 = vmatpush.msra.mxu2 %v1171_v43  ;;  %v1167_v47 = vunpack.c.h.bf16 %v1165_v41 }
  0xa6   : > { %v348_v1 = vadd.f32 %v347_v58, %v346_v53  ;;  %v364_v2 = vrot.slane %v363_v59, 2  ;;  %v399_v3 = vadd.f32 %v398_v60, %v397_v55  ;;  %v408_v4 = vrot.slane %v407_v61, 2  ;;  %v393_v53 = vld [vmem:[%s1721_s4 + $0x1] sm:$0x1]  ;;  %v342_v55 = vld [vmem:[%s1721_s4 + $0x7] sm:$0x1] }
  0xa7   : > { %466 = vmatpush.msra.mxu2 %v1170_v44 }
  0xa8   : > { %v349_v6 = vrot.slane %v348_v1, 1  ;;  %v365_v7 = vadd.f32 %v364_v2, %v363_v59  ;;  %v400_v8 = vrot.slane %v399_v3, 1  ;;  %v409_v9 = vadd.f32 %v408_v4, %v407_v61  ;;  %v394_v61 = vld [vmem:[%s1721_s4 + $0x2] sm:$0x1] }
  0xa9   : > { %467 = vmatpush.msra.mxu2 %v1167_v47 }
  0xaa   : > { %v366_v13 = vrot.slane %v365_v7, 1  ;;  %v401_v14 = vadd.f32 %v400_v8, %v399_v3  ;;  %v410_v15 = vrot.slane %v409_v9, 1  ;;  %v350_v19 = vadd.f32 %v349_v6, %v348_v1 }
  0xab   : > { %468 = vmatpush.msra.mxu2 %v1166_v50 }
  0xac   : > { %v367_v20 = vadd.f32 %v366_v13, %v365_v7  ;;  %v402_v21 = vmul.f32 %v401_v14, %v1589_v11  ;;  %v411_v22 = vadd.f32 %v410_v15, %v409_v9  ;;  %v358_v25 = vmul.f32 %v1589_v11, %v350_v19  ;;  %v1363_v19 = vld [vmem:[#allocation2 + $0x80] sm:$0xff]  }
  0xae   : > { %v412_v24 = vmul.f32 %v411_v22, %v1589_v11  ;;  %v413_v27 = vmul.f32 %v402_v21, %v402_v21  ;;  %v368_v29 = vmul.f32 %v367_v20, %v1589_v11  ;;  %v369_v30 = vmul.f32 %v358_v25, %v358_v25  ;;  %v1362_v22 = vld [vmem:[#allocation2 + $0x78] sm:$0xff]  }
  0xb0   : > { %v414_v31 = vsub.f32 %v412_v24, %v413_v27  ;;  %v370_v32 = vsub.f32 %v368_v29, %v369_v30  ;;  %v1227_v24 = vunpack.c.h.bf16 %v1362_v22  ;;  %v1361_v27 = vld [vmem:[#allocation2 + $0x70] sm:$0xff]   ;;  %v1226_v29 = vunpack.c.l.bf16 %v1362_v22 }
  0xb1   : > { %v1223_v30 = vunpack.c.h.bf16 %v1361_v27 }
  0xb2   : > { %v415_v33 = vadd.f32 1e-05, %v414_v31  ;;  %v371_v35 = vadd.f32 1e-05, %v370_v32  ;;  %v1360_v32 = vld [vmem:[#allocation2 + $0x68] sm:$0xff]  }
  0xb3   : > { %v1218_v43 = vunpack.c.l.bf16 %v1360_v32 }
  0xb4   : > { %1427 = vrsqrt.f32 %v415_v33  ;;  %vm422_vm2 = vweird.f32 %v415_v33  ;;  %vm378_vm6 = vweird.f32 %v371_v35 }
  0xb5   : > { %1429 = vrsqrt.f32 %v371_v35 }
  0xba   : > { %v1428_v37 = vpop.eup %1427 }
  0xbb   : > { %v1430_v38 = vpop.eup %1429  ;;  %v417_v39 = vmul.f32 %v1428_v37, %v415_v33  ;;  %vm423_vm3 = vweird.f32 %v1428_v37 }
  0xbc   : > { %v373_v42 = vmul.f32 %v1430_v38, %v371_v35  ;;  %vm424_vm4 = vmor %vm422_vm2, %vm423_vm3  ;;  %vm379_vm5 = vweird.f32 %v1430_v38  ;;  %v1222_v35 = vunpack.c.l.bf16 %v1361_v27 }
  0xbd   : > { %v418_v45 = vmul.f32 %v1428_v37, %v417_v39  ;;  %vm380_vm7 = vmor %vm378_vm6, %vm379_vm5 }
  0xbe   : > { %v374_v46 = vmul.f32 %v1430_v38, %v373_v42  ;;  %v1359_v42 = vld [vmem:[#allocation2 + $0x60] sm:$0xff]  }
  0xbf   : > { %v419_v48 = vmul.f32 0.5, %v418_v45  ;;  %v1214_v50 = vunpack.c.l.bf16 %v1359_v42 }
  0xc0   : > { %v375_v49 = vmul.f32 0.5, %v374_v46  ;;  %v1215_v46 = vunpack.c.h.bf16 %v1359_v42  ;;  %v1366_v42 = vld [vmem:[#allocation2 + $0x98] sm:$0xff]  }
  0xc1   : > { %v420_v51 = vsub.f32 1.5, %v419_v48 }
  0xc2   : > { %v376_v52 = vsub.f32 1.5, %v375_v49  ;;  %v1358_v49 = vld [vmem:[#allocation2 + $0x58] sm:$0xff]  }
  0xc3   : > { %v421_v54 = vmul.f32 %v1428_v37, %v420_v51 }
  0xc4   : > { %v377_v56 = vmul.f32 %v1430_v38, %v376_v52 }
  0xc5   : > { %v425_v57 = vsel %vm424_vm4, %v1428_v37, %v421_v54 }
  0xc6   : > { %v426_v58 = vmul.f32 %v425_v57, %v393_v53  ;;  %v381_v59 = vsel %vm380_vm7, %v1430_v38, %v377_v56  ;;  %v1219_v38 = vunpack.c.h.bf16 %v1360_v32  ;;  %v1211_v53 = vunpack.c.h.bf16 %v1358_v49  ;;  %v1357_v56 = vld [vmem:[#allocation2 + $0x50] sm:$0xff]  }
  0xc7   : > { %v382_v60 = vmul.f32 %v381_v59, %v342_v55  ;;  %v1210_v57 = vunpack.c.l.bf16 %v1358_v49 }
  0xc8   : > { %v429_v62 = vperm.slane %v426_v58, 0  ;;  %v427_v0 = vmul.f32 %v426_v58, %v402_v21  ;;  %v1231_v21 = vunpack.c.h.bf16 %v1363_v19 }
  0xc9   : > { %v383_v1 = vmul.f32 %v382_v60, %v358_v25  ;;  %v385_v2 = vperm.slane %v382_v60, 0  ;;  %v1230_v25 = vunpack.c.l.bf16 %v1363_v19  ;;  %v1207_v60 = vunpack.c.h.bf16 %v1357_v56  ;;  %v577_v19 = vld [vmem:[%s1721_s4 + $0xa] sm:$0x1] }
  0xca   : > { %v428_v3 = vsub.f32 %v394_v61, %v427_v0  ;;  %v430_v4 = vmul.f32 %v429_v62, %v1569_v26  ;;  %v431_v9 = vmul.f32 %v429_v62, %v1577_v36 }
  0xcb   : > { %v384_v5 = vsub.f32 %v343_v63, %v383_v1  ;;  %v386_v7 = vmul.f32 %v385_v2, %v1571_v28  ;;  %v387_v16 = vmul.f32 %v385_v2, %v1573_v34  ;;  %v1364_v28 = vld [vmem:[#allocation2 + $0x88] sm:$0xff]   ;;  %v1206_v63 = vunpack.c.l.bf16 %v1357_v56 }
  0xcc   : > { %v432_v6 = vperm.slane %v428_v3, 0  ;;  %v1235_v20 = vunpack.c.h.bf16 %v1364_v28  ;;  %v1234_v36 = vunpack.c.l.bf16 %v1364_v28  ;;  %v1420_v34 = vld [vmem:[%s1721_s4 + $0x9] ss:$0 sm:$0xff]  ;;  %v1369_v28 = vld [vmem:[#allocation2 + $0xb0] sm:$0xff]  }
  0xcd   : > { %v388_v8 = vperm.slane %v384_v5, 0  ;;  %v1255_v22 = vunpack.c.h.bf16 %v1369_v28 }
  0xce   : > { %v433_v10 = vadd.f32 %v432_v6, %v430_v4  ;;  %v434_v15 = vadd.f32 %v432_v6, %v431_v9  ;;  %653 = vmatpush.msrb.mxu0 %v1235_v20 }
  0xcf   : > { %v389_v12 = vadd.f32 %v388_v8, %v386_v7  ;;  %v390_v17 = vadd.f32 %v388_v8, %v387_v16  ;;  %v1372_v7 = vld [vmem:[#allocation2 + $0xc8] sm:$0xff]   ;;  %v1371_v8 = vld [vmem:[#allocation2 + $0xc0] sm:$0xff]  }
  0xd0   : > { %v435_v13 = vmax.f32 %v433_v10, 0.0  ;;  %v436_v18 = vmax.f32 %v434_v15, 0.0  ;;  %654 = vmatpush.msrb.mxu0 %v1234_v36  ;;  %v1267_v10 = vunpack.c.h.bf16 %v1372_v7  ;;  %v1370_v15 = vld [vmem:[#allocation2 + $0xb8] sm:$0xff]  }
  0xd1   : > { %v391_v14 = vmax.f32 %v389_v12, 0.0  ;;  %v392_v26 = vmax.f32 %v390_v17, 0.0  ;;  %v1266_v12 = vunpack.c.l.bf16 %v1372_v7  ;;  %v1262_v17 = vunpack.c.l.bf16 %v1371_v8 }
  0xd2   : > { %1154 = vmatmul.msk.f32.vlgmr.msra.gmra.mxu2 %vm281_vm0, %v435_v13  ;;  %655 = vmatpush.msrb.mxu0 %v1231_v21  ;;  %v1258_v36 = vunpack.c.l.bf16 %v1370_v15 }
  0xd3   : > { %570 = vmatmul.f32.vlgmr.msra.gmra.mxu3 %v391_v14  ;;  %712 = vmatpush.msrb.mxu1 %v1267_v10  ;;  %v1263_v14 = vunpack.c.h.bf16 %v1371_v8 }
  0xd4   : > { %656 = vmatpush.msrb.mxu0 %v1230_v25  ;;  %v1368_v25 = vld [vmem:[#allocation2 + $0xa8] sm:$0xff]  }
  0xd5   : > { %713 = vmatpush.msrb.mxu1 %v1266_v12 }
  0xd6   : > { %657 = vmatpush.msrb.mxu0 %v1227_v24  ;;  %v578_v24 = vld [vmem:[%s1721_s4 + $0xb] sm:$0x1] }
  0xd7   : > { %714 = vmatpush.msrb.mxu1 %v1263_v14 }
  0xd8   : > { %658 = vmatpush.msrb.mxu0 %v1226_v29 }
  0xd9   : > { %715 = vmatpush.msrb.mxu1 %v1262_v17 }
  0xda   : > { %1155 = vmatmul.msk.f32.gmra.mxu2 %vm281_vm0, %v436_v18  ;;  %659 = vmatpush.msrb.mxu0 %v1223_v30  ;;  %v1251_v30 = vunpack.c.h.bf16 %v1368_v25 }
  0xdb   : > { %573 = vmatmul.f32.gmra.mxu3 %v392_v26  ;;  %v1259_v26 = vunpack.c.h.bf16 %v1370_v15  ;;  %v1365_v15 = vld [vmem:[#allocation2 + $0x90] sm:$0xff]  }
  0xdc   : > { %660 = vmatpush.msrb.mxu0 %v1222_v35  ;;  %v1250_v35 = vunpack.c.l.bf16 %v1368_v25 }
  0xdd   : > { %716 = vmatpush.msrb.mxu1 %v1259_v26 }
  0xde   : > { %661 = vmatpush.msrb.mxu0 %v1219_v38 }
  0xdf   : > { %717 = vmatpush.msrb.mxu1 %v1258_v36 }
  0xe0   : > { %662 = vmatpush.msrb.mxu0 %v1218_v43 }
  0xe1   : > { %718 = vmatpush.msrb.mxu1 %v1255_v22 }
  0xe2   : > { %663 = vmatpush.msrb.mxu0 %v1215_v46 }
  0xe4   : > { %664 = vmatpush.msrb.mxu0 %v1214_v50  ;;  %v1421_v50 = vld [vmem:[%s1721_s4 + $0x3] ss:$0 sm:$0xff] }
  0xe6   : > { %665 = vmatpush.msrb.mxu0 %v1211_v53 }
  0xe8   : > { %666 = vmatpush.msrb.mxu0 %v1210_v57 }
  0xea   : > { %667 = vmatpush.msrb.mxu0 %v1207_v60 }
  0xec   : > { %668 = vmatpush.msrb.mxu0 %v1206_v63 }
 0x155   : > { %v470_v49 = vpop.f32.mrf.mxu2 }
 0x156   : > { %v571_v23 = vpop.f32.mrf.mxu3 }
 0x157   : > { %v1616_v31 = vadd.f32 %v1420_v34, %v571_v23 }
 0x159   : > { %v587_v39 = vmul.f32 %v1616_v31, %v1616_v31 }
 0x15e   : > { %v574_v33 = vpop.f32.mrf.mxu3 }
 0x15f   : > { %v1618_v37 = vadd.f32 %v1420_v34, %v574_v33  ;;  %v1254_v34 = vunpack.c.l.bf16 %v1369_v28  ;;  %v1367_v33 = vld [vmem:[#allocation2 + $0xa0] sm:$0xff]  }
 0x160   : > { %v1246_v43 = vunpack.c.l.bf16 %v1367_v33  ;;  %v476_v28 = vld [vmem:[%s1721_s4 + $0x4] sm:$0x1] }
 0x161   : > { %v579_v40 = vadd.f32 %v1618_v37, %v1616_v31  ;;  %v588_v41 = vmul.f32 %v1618_v37, %v1618_v37  ;;  %719 = vmatpush.msrb.mxu1 %v1254_v34 }
 0x163   : > { %v580_v44 = vrot.slane %v579_v40, 4  ;;  %v589_v45 = vadd.f32 %v588_v41, %v587_v39  ;;  %720 = vmatpush.msrb.mxu1 %v1251_v30 }
 0x165   : > { %v581_v47 = vadd.f32 %v580_v44, %v579_v40  ;;  %v590_v48 = vrot.slane %v589_v45, 4  ;;  %v1247_v40 = vunpack.c.h.bf16 %v1367_v33  ;;  %721 = vmatpush.msrb.mxu1 %v1250_v35 }
 0x167   : > { %v582_v51 = vrot.slane %v581_v47, 2  ;;  %v591_v52 = vadd.f32 %v590_v48, %v589_v45  ;;  %722 = vmatpush.msrb.mxu1 %v1247_v40  ;;  %v1243_v45 = vunpack.c.h.bf16 %v1366_v42  ;;  %v1376_v40 = vld [vmem:[#allocation2 + $0xe8] sm:$0xff]  }
 0x169   : > { %v583_v54 = vadd.f32 %v582_v51, %v581_v47  ;;  %v592_v55 = vrot.slane %v591_v52, 2  ;;  %723 = vmatpush.msrb.mxu1 %v1246_v43  ;;  %v1242_v47 = vunpack.c.l.bf16 %v1366_v42  ;;  %v473_v51 = vpop.f32.mrf.mxu2  ;;  %v1283_v42 = vunpack.c.h.bf16 %v1376_v40 }
 0x16a   : > { %v474_v53 = vadd.f32 %v1421_v50, %v473_v51  ;;  %v1282_v43 = vunpack.c.l.bf16 %v1376_v40 }
 0x16b   : > { %v584_v58 = vrot.slane %v583_v54, 1  ;;  %v593_v59 = vadd.f32 %v592_v55, %v591_v52  ;;  %724 = vmatpush.msrb.mxu1 %v1243_v45  ;;  %v471_v52 = vadd.f32 %v1421_v50, %v470_v49  ;;  %804 = vmatpush.msrb.mxu2 %v1283_v42  ;;  %v1375_v45 = vld [vmem:[#allocation2 + $0xe0] sm:$0xff]   ;;  %v1374_v49 = vld [vmem:[#allocation2 + $0xd8] sm:$0xff]  }
 0x16c   : > { %v487_v55 = vmul.f32 %v474_v53, %v474_v53  ;;  %v1275_v50 = vunpack.c.h.bf16 %v1374_v49  ;;  %v1274_v51 = vunpack.c.l.bf16 %v1374_v49 }
 0x16d   : > { %v585_v61 = vadd.f32 %v584_v58, %v583_v54  ;;  %v594_v62 = vrot.slane %v593_v59, 1  ;;  %725 = vmatpush.msrb.mxu1 %v1242_v47  ;;  %v478_v54 = vadd.f32 %v474_v53, %v471_v52  ;;  %805 = vmatpush.msrb.mxu2 %v1282_v43  ;;  %v1278_v47 = vunpack.c.l.bf16 %v1375_v45 }
 0x16f   : > { %v595_v0 = vadd.f32 %v594_v62, %v593_v59  ;;  %v586_v1 = vmul.f32 %v585_v61, %v1589_v11  ;;  %v479_v56 = vrot.slane %v478_v54, 4 }
 0x171   : > { %v596_v2 = vmul.f32 %v595_v0, %v1589_v11  ;;  %v597_v3 = vmul.f32 %v586_v1, %v586_v1  ;;  %v480_v58 = vadd.f32 %v479_v56, %v478_v54  ;;  %v1422_v54 = vld [vmem:[%s1721_s4 + $0xc] ss:$0 sm:$0xff] }
 0x173   : > { %v598_v4 = vsub.f32 %v596_v2, %v597_v3  ;;  %v481_v60 = vrot.slane %v480_v58, 2 }
 0x175   : > { %v599_v5 = vadd.f32 1e-05, %v598_v4  ;;  %v482_v62 = vadd.f32 %v481_v60, %v480_v58  ;;  %v1384_v58 = vld [vmem:[#allocation2 + $0x128] sm:$0xff]  }
 0x177   : > { %1431 = vrsqrt.f32 %v599_v5  ;;  %vm606_vm9 = vweird.f32 %v599_v5  ;;  %v483_v0 = vrot.slane %v482_v62, 1 }
 0x179   : > { %v484_v2 = vadd.f32 %v483_v0, %v482_v62  ;;  %v1314_v62 = vunpack.c.l.bf16 %v1384_v58 }
 0x17d   : > { %v1432_v6 = vpop.eup %1431 }
 0x17e   : > { %v601_v9 = vmul.f32 %v1432_v6, %v599_v5  ;;  %vm607_vm8 = vweird.f32 %v1432_v6  ;;  %v485_v5 = vmul.f32 %v484_v2, %v1589_v11 }
 0x17f   : > { %vm608_vm10 = vmor %vm606_vm9, %vm607_vm8 }
 0x180   : > { %v602_v13 = vmul.f32 %v1432_v6, %v601_v9  ;;  %v496_v7 = vmul.f32 %v485_v5, %v485_v5 }
 0x182   : > { %v603_v16 = vmul.f32 0.5, %v602_v13 }
 0x184   : > { %v604_v18 = vsub.f32 1.5, %v603_v16  ;;  %v1239_v16 = vunpack.c.h.bf16 %v1365_v15 }
 0x186   : > { %v605_v20 = vmul.f32 %v1432_v6, %v604_v18  ;;  %726 = vmatpush.msrb.mxu1 %v1239_v16  ;;  %v1238_v18 = vunpack.c.l.bf16 %v1365_v15 }
 0x188   : > { %v609_v21 = vsel %vm608_vm10, %v1432_v6, %v605_v20  ;;  %727 = vmatpush.msrb.mxu1 %v1238_v18 }
 0x189   : > { %v610_v23 = vmul.f32 %v609_v21, %v577_v19  ;;  %v477_v21 = vld [vmem:[%s1721_s4 + $0x5] sm:$0x1] }
 0x18b   : > { %v611_v27 = vmul.f32 %v610_v23, %v586_v1  ;;  %v613_v29 = vperm.slane %v610_v23, 0 }
 0x18d   : > { %v612_v32 = vsub.f32 %v578_v24, %v611_v27  ;;  %v614_v38 = vmul.f32 %v613_v29, %v1616_v31  ;;  %v615_v46 = vmul.f32 %v613_v29, %v1618_v37  ;;  %v486_v37 = vmul.f32 %v471_v52, %v471_v52 }
 0x18f   : > { %v616_v39 = vperm.slane %v612_v32, 0  ;;  %v488_v57 = vadd.f32 %v487_v55, %v486_v37 }
 0x191   : > { %v1635_v41 = vadd.f32 %v616_v39, %v614_v38  ;;  %v1641_v31 = vadd.f32 %v616_v39, %v615_v46  ;;  %v489_v59 = vrot.slane %v488_v57, 4  ;;  %v1279_v46 = vunpack.c.h.bf16 %v1375_v45 }
 0x193   : > { %v619_v44 = vmax.f32 %v1635_v41, 0.0  ;;  %v620_v48 = vmax.f32 %v1641_v31, 0.0  ;;  %v490_v61 = vadd.f32 %v489_v59, %v488_v57  ;;  %806 = vmatpush.msrb.mxu2 %v1279_v46  ;;  %v1383_v59 = vld [vmem:[#allocation2 + $0x120] sm:$0xff]  }
 0x194   : > { %v1311_v0 = vunpack.c.h.bf16 %v1383_v59 }
 0x195   : > { %669 = vmatmul.f32.vlgmr.msrb.gmra.mxu0 %v619_v44  ;;  %v491_v63 = vrot.slane %v490_v61, 2  ;;  %807 = vmatpush.msrb.mxu2 %v1278_v47 }
 0x197   : > { %v492_v1 = vadd.f32 %v491_v63, %v490_v61  ;;  %808 = vmatpush.msrb.mxu2 %v1275_v50  ;;  %v1315_v61 = vunpack.c.h.bf16 %v1384_v58  ;;  %v1392_v58 = vld [vmem:[#allocation2 + $0x168] sm:$0xff]  }
 0x199   : > { %v493_v3 = vrot.slane %v492_v1, 1  ;;  %809 = vmatpush.msrb.mxu2 %v1274_v51 }
 0x19b   : > { %v494_v4 = vadd.f32 %v493_v3, %v492_v1  ;;  %v1382_v3 = vld [vmem:[#allocation2 + $0x118] sm:$0xff]  }
 0x19d   : > { %672 = vmatmul.f32.gmra.mxu0 %v620_v48  ;;  %v495_v6 = vmul.f32 %v494_v4, %v1589_v11 }
 0x19f   : > { %v497_v8 = vsub.f32 %v495_v6, %v496_v7  ;;  %v1307_v6 = vunpack.c.h.bf16 %v1382_v3  ;;  %v1381_v7 = vld [vmem:[#allocation2 + $0x110] sm:$0xff]  }
 0x1a0   : > { %v1302_v15 = vunpack.c.l.bf16 %v1381_v7 }
 0x1a1   : > { %v498_v9 = vadd.f32 1e-05, %v497_v8  ;;  %v1306_v8 = vunpack.c.l.bf16 %v1382_v3 }
 0x1a3   : > { %1433 = vrsqrt.f32 %v498_v9  ;;  %vm505_vm11 = vweird.f32 %v498_v9 }
 0x1a9   : > { %v1434_v10 = vpop.eup %1433 }
 0x1aa   : > { %v500_v12 = vmul.f32 %v1434_v10, %v498_v9  ;;  %vm506_vm12 = vweird.f32 %v1434_v10  ;;  %v1303_v9 = vunpack.c.h.bf16 %v1381_v7  ;;  %v1389_v7 = vld [vmem:[#allocation2 + $0x150] sm:$0xff]  }
 0x1ab   : > { %vm507_vm13 = vmor %vm505_vm11, %vm506_vm12 }
 0x1ac   : > { %v501_v13 = vmul.f32 %v1434_v10, %v500_v12  ;;  %v1380_v12 = vld [vmem:[#allocation2 + $0x108] sm:$0xff]  }
 0x1ae   : > { %v502_v14 = vmul.f32 0.5, %v501_v13 }
 0x1b0   : > { %v503_v17 = vsub.f32 1.5, %v502_v14 }
 0x1b2   : > { %v504_v26 = vmul.f32 %v1434_v10, %v503_v17  ;;  %v1299_v17 = vunpack.c.h.bf16 %v1380_v12 }
 0x1b4   : > { %v508_v19 = vsel %vm507_vm13, %v1434_v10, %v504_v26  ;;  %v1379_v26 = vld [vmem:[#allocation2 + $0x100] sm:$0xff]  }
 0x1b5   : > { %v509_v20 = vmul.f32 %v508_v19, %v476_v28  ;;  %v1298_v19 = vunpack.c.l.bf16 %v1380_v12  ;;  %v1334_v12 = vunpack.c.l.bf16 %v1389_v7 }
 0x1b7   : > { %v510_v36 = vmul.f32 %v509_v20, %v485_v5  ;;  %v512_v23 = vperm.slane %v509_v20, 0  ;;  %v1310_v5 = vunpack.c.l.bf16 %v1383_v59 }
 0x1b9   : > { %v511_v22 = vsub.f32 %v477_v21, %v510_v36  ;;  %v513_v25 = vmul.f32 %v512_v23, %v471_v52  ;;  %v514_v29 = vmul.f32 %v512_v23, %v474_v53  ;;  %v1373_v52 = vld [vmem:[#allocation2 + $0xd0] sm:$0xff]   ;;  %v1295_v21 = vunpack.c.h.bf16 %v1379_v26  ;;  %v1378_v23 = vld [vmem:[#allocation2 + $0xf8] sm:$0xff]  }
 0x1ba   : > { %v1271_v53 = vunpack.c.h.bf16 %v1373_v52  ;;  %v1270_v37 = vunpack.c.l.bf16 %v1373_v52  ;;  %v1290_v43 = vunpack.c.l.bf16 %v1378_v23  ;;  %v1377_v52 = vld [vmem:[#allocation2 + $0xf0] sm:$0xff]  }
 0x1bb   : > { %v515_v24 = vperm.slane %v511_v22, 0 }
 0x1bc   : > { %810 = vmatpush.msrb.mxu2 %v1271_v53  ;;  %v1287_v53 = vunpack.c.h.bf16 %v1377_v52 }
 0x1bd   : > { %v1657_v34 = vadd.f32 %v515_v24, %v513_v25  ;;  %v1662_v33 = vadd.f32 %v515_v24, %v514_v29  ;;  %v1294_v29 = vunpack.c.l.bf16 %v1379_v26 }
 0x1be   : > { %811 = vmatpush.msrb.mxu2 %v1270_v37  ;;  %v1286_v37 = vunpack.c.l.bf16 %v1377_v52  ;;  %v1018_v52 = vld [vmem:[%s259_s23] sm:$0xff] }
 0x1bf   : > { %v518_v27 = vmax.f32 %v1657_v34, 0.0  ;;  %v519_v35 = vmax.f32 %v1662_v33, 0.0  ;;  %vm1022_vm7 = vcmp.ge.s32.totalorder %v1018_v52, 0  ;;  %vm1024_vm8 = vcmp.lt.s32.totalorder %v1018_v52, 2 }
 0x1c0   : > { %855 = vmatpush.msra.mxu2 %v1315_v61  ;;  %v1346_v61 = vunpack.c.l.bf16 %v1392_v58  ;;  %vm1026_vm9 = vmand %vm1022_vm7, %vm1024_vm8 }
 0x1c2   : > { %856 = vmatpush.msra.mxu2 %v1314_v62  ;;  %v1423_v62 = vld [vmem:[%s1721_s4 + $0xd] ss:$0 sm:$0xff] }
 0x1c4   : > { %857 = vmatpush.msra.mxu2 %v1311_v0 }
 0x1c6   : > { %858 = vmatpush.msra.mxu2 %v1310_v5 }
 0x1c8   : > { %859 = vmatpush.msra.mxu2 %v1307_v6 }
 0x1ca   : > { %860 = vmatpush.msra.mxu2 %v1306_v8  ;;  %v1335_v8 = vunpack.c.h.bf16 %v1389_v7 }
 0x1cc   : > { %861 = vmatpush.msra.mxu2 %v1303_v9 }
 0x1ce   : > { %862 = vmatpush.msra.mxu2 %v1302_v15  ;;  %v1388_v15 = vld [vmem:[#allocation2 + $0x148] sm:$0xff]  }
 0x1cf   : > { %v1330_v26 = vunpack.c.l.bf16 %v1388_v15 }
 0x1d0   : > { %863 = vmatpush.msra.mxu2 %v1299_v17 }
 0x1d2   : > { %864 = vmatpush.msra.mxu2 %v1298_v19 }
 0x1d4   : > { %865 = vmatpush.msra.mxu2 %v1295_v21 }
 0x1d6   : > { %866 = vmatpush.msra.mxu2 %v1294_v29  ;;  %v1386_v29 = vld [vmem:[#allocation2 + $0x138] sm:$0xff]  }
 0x212   : > { %v670_v30 = vpop.f32.mrf.mxu0 }
 0x213   : > { %v676_v32 = vmul.f32 %v670_v30, %v518_v27 }
 0x215   : > { %728 = vmatmul.f32.vlgmr.msrb.gmra.mxu1 %v676_v32 }
 0x21a   : > { %v673_v38 = vpop.f32.mrf.mxu0 }
 0x21b   : > { %v677_v39 = vmul.f32 %v673_v38, %v519_v35 }
 0x21d   : > { %731 = vmatmul.f32.gmra.mxu1 %v677_v39  ;;  %v1291_v39 = vunpack.c.h.bf16 %v1378_v23 }
 0x21f   : > { %867 = vmatpush.msra.mxu2 %v1291_v39  ;;  %v1322_v39 = vunpack.c.l.bf16 %v1386_v29 }
 0x221   : > { %868 = vmatpush.msra.mxu2 %v1290_v43 }
 0x223   : > { %869 = vmatpush.msra.mxu2 %v1287_v53 }
 0x225   : > { %870 = vmatpush.msra.mxu2 %v1286_v37  ;;  %v1499_v37 = vmov 0  }
 0x226   : > { %1417 = vset.pattern.permute.xlu1 %v1499_v37  ;;  %1416 = vset.pattern.permute.xlu0 %v1499_v37 }
 0x227   : > { %1029 = vperm.xlu0 %1416, %v1018_v52  }
 0x292   : > { %v729_v55 = vpop.f32.mrf.mxu1 }
 0x293   : > { %v730_v56 = vadd.f32 %v1422_v54, %v729_v55 }
 0x295   : > { %v1156_v57 = vmul.f32 -1.442695, %v730_v56 }
 0x297   : > { %1435 = vpow2.f32 %v1156_v57 }
 0x29a   : > { %v732_v60 = vpop.f32.mrf.mxu1 }
 0x29b   : > { %v733_v63 = vadd.f32 %v1422_v54, %v732_v60  ;;  %v1347_v60 = vunpack.c.h.bf16 %v1392_v58  ;;  %v899_v58 = vld [vmem:[%s1721_s4 + $0xe] sm:$0x1] }
 0x29d   : > { %v1436_v1 = vpop.eup %1435  ;;  %v1157_v2 = vmul.f32 -1.442695, %v733_v63  ;;  %957 = vmatpush.msrb.mxu3 %v1347_v60  ;;  %v1391_v63 = vld [vmem:[#allocation2 + $0x160] sm:$0xff]  }
 0x29e   : > { %v741_v4 = vadd.f32 1.0, %v1436_v1  ;;  %v1343_v0 = vunpack.c.h.bf16 %v1391_v63  ;;  %v1342_v34 = vunpack.c.l.bf16 %v1391_v63  ;;  %v1390_v1 = vld [vmem:[#allocation2 + $0x158] sm:$0xff]   ;;  %v915_v63 = vld [vmem:[%s1721_s4 + $0xf] sm:$0x1] }
 0x29f   : > { %1437 = vpow2.f32 %v1157_v2  ;;  %958 = vmatpush.msrb.mxu3 %v1346_v61  ;;  %v1338_v3 = vunpack.c.l.bf16 %v1390_v1 }
 0x2a0   : > { %1439 = vrcp.f32 %v741_v4  ;;  %v754_v28 = vand.u32 2147483648, %v741_v4  ;;  %v752_v36 = vand.u32 2147483647, %v741_v4  ;;  %vm748_vm15 = vweird.f32 %v741_v4 }
 0x2a1   : > { %959 = vmatpush.msrb.mxu3 %v1343_v0 }
 0x2a2   : > { %v755_v24 = vor.u32 1.1754944e-38, %v754_v28  ;;  %vm753_vm2 = vcmp.eq.f32.partialorder %v752_v36, 8.507059e+37 }
 0x2a3   : > { %960 = vmatpush.msrb.mxu3 %v1342_v34 }
 0x2a5   : > { %v1438_v10 = vpop.eup %1437 }
 0x2a6   : > { %v1440_v13 = vpop.eup %1439  ;;  %v742_v14 = vadd.f32 1.0, %v1438_v10 }
 0x2a7   : > { %v744_v16 = vmul.f32 %v1440_v13, %v741_v4  ;;  %vm749_vm14 = vweird.f32 %v1440_v13 }
 0x2a8   : > { %1441 = vrcp.f32 %v742_v14  ;;  %vm750_vm0 = vmor %vm748_vm15, %vm749_vm14  ;;  %v769_v42 = vand.u32 2147483648, %v742_v14  ;;  %v767_v46 = vand.u32 2147483647, %v742_v14  ;;  %vm763_vm4 = vweird.f32 %v742_v14 }
 0x2a9   : > { %v745_v18 = vsub.f32 1.0, %v744_v16  ;;  %v1331_v16 = vunpack.c.h.bf16 %v1388_v15 }
 0x2aa   : > { %v770_v49 = vor.u32 1.1754944e-38, %v769_v42  ;;  %vm768_vm6 = vcmp.eq.f32.partialorder %v767_v46, 8.507059e+37 }
 0x2ab   : > { %v746_v20 = vmul.f32 %v1440_v13, %v745_v18 }
 0x2ad   : > { %v747_v22 = vadd.f32 %v1440_v13, %v746_v20  ;;  %v1387_v20 = vld [vmem:[#allocation2 + $0x140] sm:$0xff]  }
 0x2ae   : > { %v1442_v25 = vpop.eup %1441  ;;  %v1327_v36 = vunpack.c.h.bf16 %v1387_v20  ;;  %v1326_v23 = vunpack.c.l.bf16 %v1387_v20 }
 0x2af   : > { %v751_v30 = vsel %vm750_vm0, %v1440_v13, %v747_v22  ;;  %v759_v32 = vmul.f32 %v1442_v25, %v742_v14  ;;  %vm764_vm3 = vweird.f32 %v1442_v25 }
 0x2b0   : > { %v756_v38 = vsel %vm753_vm2, %v755_v24, %v751_v30  ;;  %vm765_vm5 = vmor %vm763_vm4, %vm764_vm3  ;;  %v1323_v30 = vunpack.c.h.bf16 %v1386_v29 }
 0x2b1   : > { %1158 = vmatmul.msk.f32.vlgmr.msrb.gmra.mxu2 %vm789_vm1, %v756_v38  ;;  %v760_v40 = vsub.f32 1.0, %v759_v32 }
 0x2b3   : > { %v761_v45 = vmul.f32 %v1442_v25, %v760_v40  ;;  %v1385_v40 = vld [vmem:[#allocation2 + $0x130] sm:$0xff]  }
 0x2b4   : > { %v1319_v42 = vunpack.c.h.bf16 %v1385_v40  ;;  %v1318_v46 = vunpack.c.l.bf16 %v1385_v40 }
 0x2b5   : > { %v762_v47 = vadd.f32 %v1442_v25, %v761_v45 }
 0x2b7   : > { %v766_v50 = vsel %vm765_vm5, %v1442_v25, %v762_v47 }
 0x2b8   : > { %v771_v51 = vsel %vm768_vm6, %v770_v49, %v766_v50 }
 0x2b9   : > { %1159 = vmatmul.msk.f32.gmra.mxu2 %vm789_vm1, %v771_v51 }
 0x334   : > { %v813_v54 = vpop.f32.mrf.mxu2 }
 0x335   : > { %v819_v55 = vmul.f32 %v813_v54, %v518_v27 }
 0x337   : > { %871 = vmatmul.f32.vlgmr.msra.gmra.mxu2 %v819_v55  ;;  %v1036_v55 = vsel %vm1026_vm9, 1, %v1499_v37 }
 0x338   : > { %1039 = vperm.xlu1 %1417, %v1036_v55  }
 0x33c   : > { %v816_v56 = vpop.f32.mrf.mxu2 }
 0x33d   : > { %v820_v57 = vmul.f32 %v816_v56, %v519_v35  ;;  %v1339_v35 = vunpack.c.h.bf16 %v1390_v1 }
 0x33f   : > { %874 = vmatmul.f32.gmra.mxu2 %v820_v57  ;;  %961 = vmatpush.msrb.mxu3 %v1339_v35 }
 0x341   : > { %962 = vmatpush.msrb.mxu3 %v1338_v3 }
 0x343   : > { %963 = vmatpush.msrb.mxu3 %v1335_v8  ;;  %v1424_v8 = vld [vmem:[%s1721_s4 + $0x10] ss:$0 sm:$0xff] }
 0x345   : > { %964 = vmatpush.msrb.mxu3 %v1334_v12 }
 0x347   : > { %965 = vmatpush.msrb.mxu3 %v1331_v16 }
 0x349   : > { %966 = vmatpush.msrb.mxu3 %v1330_v26 }
 0x34b   : > { %967 = vmatpush.msrb.mxu3 %v1327_v36 }
 0x34d   : > { %968 = vmatpush.msrb.mxu3 %v1326_v23 }
 0x34f   : > { %969 = vmatpush.msrb.mxu3 %v1323_v30 }
 0x351   : > { %970 = vmatpush.msrb.mxu3 %v1322_v39 }
 0x353   : > { %971 = vmatpush.msrb.mxu3 %v1319_v42 }
 0x355   : > { %972 = vmatpush.msrb.mxu3 %v1318_v46 }
 0x3aa   : > { %v1040_v26 = vpop.permute.xlu1 %1039 }
 0x3ab   : > { %vm1044_vm1 = vcmp.eq.s32.totalorder %v1040_v26, 1 }
 0x3ba   : > { %v872_v59 = vpop.f32.mrf.mxu2 }
 0x3bb   : > { %v1679_v27 = vadd.f32 %v1423_v62, %v872_v59 }
 0x3bd   : > { %v886_v4 = vmul.f32 %v1679_v27, %v1679_v27 }
 0x3c2   : > { %v875_v33 = vpop.f32.mrf.mxu2 }
 0x3c3   : > { %v1681_v2 = vadd.f32 %v1423_v62, %v875_v33 }
 0x3c5   : > { %v878_v5 = vadd.f32 %v1681_v2, %v1679_v27  ;;  %v887_v6 = vmul.f32 %v1681_v2, %v1681_v2 }
 0x3c7   : > { %v879_v9 = vrot.slane %v878_v5, 4  ;;  %v888_v10 = vadd.f32 %v887_v6, %v886_v4 }
 0x3c9   : > { %v880_v13 = vadd.f32 %v879_v9, %v878_v5  ;;  %v889_v14 = vrot.slane %v888_v10, 4 }
 0x3cb   : > { %v881_v17 = vrot.slane %v880_v13, 2  ;;  %v890_v18 = vadd.f32 %v889_v14, %v888_v10 }
 0x3cd   : > { %v882_v28 = vadd.f32 %v881_v17, %v880_v13  ;;  %v891_v19 = vrot.slane %v890_v18, 2 }
 0x3cf   : > { %v883_v21 = vrot.slane %v882_v28, 1  ;;  %v892_v22 = vadd.f32 %v891_v19, %v890_v18  ;;  %v1030_v18 = vpop.permute.xlu0 %1029 }
 0x3d1   : > { %v884_v25 = vadd.f32 %v883_v21, %v882_v28  ;;  %v893_v24 = vrot.slane %v892_v22, 1 }
 0x3d3   : > { %v885_v32 = vmul.f32 %v884_v25, %v1589_v11  ;;  %v894_v38 = vadd.f32 %v893_v24, %v892_v22 }
 0x3d5   : > { %v895_v43 = vmul.f32 %v894_v38, %v1589_v11  ;;  %v896_v45 = vmul.f32 %v885_v32, %v885_v32  ;;  %v1019_v11 = vld [vmem:[%s259_s23 + $0x8] sm:$0xff] }
 0x3d6   : > { %vm1023_vm10 = vcmp.ge.s32.totalorder %v1019_v11, 0  ;;  %vm1025_vm11 = vcmp.lt.s32.totalorder %v1019_v11, 2  ;;  %1032 = vperm.xlu0 %1416, %v1019_v11  }
 0x3d7   : > { %v897_v47 = vsub.f32 %v895_v43, %v896_v45  ;;  %vm1027_vm13 = vmand %vm1023_vm10, %vm1025_vm11 }
 0x3d8   : > { %v1037_v60 = vsel %vm1027_vm13, 1, %v1499_v37 }
 0x3d9   : > { %v898_v49 = vmul.f32 1.0666667, %v897_v47  ;;  %1042 = vperm.xlu1 %1417, %v1037_v60  }
 0x3db   : > { %v900_v50 = vadd.f32 1e-05, %v898_v49 }
 0x3dd   : > { %1443 = vrsqrt.f32 %v900_v50  ;;  %vm907_vm14 = vweird.f32 %v900_v50 }
 0x3e3   : > { %v1444_v51 = vpop.eup %1443 }
 0x3e4   : > { %v902_v53 = vmul.f32 %v1444_v51, %v900_v50  ;;  %vm908_vm12 = vweird.f32 %v1444_v51 }
 0x3e5   : > { %vm909_vm15 = vmor %vm907_vm14, %vm908_vm12  ;;  %vm1054_vm14 = vcmask 7168  }
 0x3e6   : > { %v903_v54 = vmul.f32 %v1444_v51, %v902_v53 }
 0x3e8   : > { %v904_v56 = vmul.f32 0.5, %v903_v54 }
 0x3ea   : > { %v905_v57 = vsub.f32 1.5, %v904_v56 }
 0x3ec   : > { %v906_v59 = vmul.f32 %v1444_v51, %v905_v57 }
 0x3ee   : > { %v910_v61 = vsel %vm909_vm15, %v1444_v51, %v906_v59 }
 0x3ef   : > { %v911_v62 = vmul.f32 %v910_v61, %v899_v58 }
 0x3f1   : > { %v912_v0 = vperm.slane %v911_v62, 0  ;;  %v916_v34 = vmul.f32 %v911_v62, %v885_v32 }
 0x3f3   : > { %v917_v1 = vsub.f32 %v915_v63, %v916_v34  ;;  %v913_v33 = vmul.f32 %v912_v0, %v1679_v27  ;;  %v914_v5 = vmul.f32 %v912_v0, %v1681_v2  ;;  %v1020_v2 = vlaneseq }
 0x3f5   : > { %v918_v35 = vperm.slane %v917_v1, 0  ;;  %v1021_v16 = vand.u32 127, %v1020_v2 }
 0x3f7   : > { %v919_v3 = vadd.f32 %v918_v35, %v913_v33  ;;  %v920_v6 = vadd.f32 %v918_v35, %v914_v5  ;;  %vm1034_vm0 = vcmp.eq.s32.totalorder %v1021_v16, %v1030_v18 }
 0x3f8   : > { %vm1046_vm4 = vmand %vm1034_vm0, %vm1044_vm1 }
 0x3f9   : > { %v921_v4 = vadd.f32 %v919_v3, %v619_v44  ;;  %v922_v7 = vadd.f32 %v920_v6, %v620_v48 }
 0x3fb   : > { %973 = vmatmul.f32.vlgmr.msrb.gmra.mxu3 %v921_v4 }
 0x403   : > { %976 = vmatmul.f32.gmra.mxu3 %v922_v7 }
 0x448   : > { %v1033_v38 = vpop.permute.xlu0 %1032 }
 0x449   : > { %vm1035_vm8 = vcmp.eq.s32.totalorder %v1021_v16, %v1033_v38 }
 0x44b   : > { %v1043_v39 = vpop.permute.xlu1 %1042 }
 0x44c   : > { %vm1045_vm9 = vcmp.eq.s32.totalorder %v1043_v39, 1 }
 0x44d   : > { %vm1047_vm13 = vmand %vm1035_vm8, %vm1045_vm9 }
 0x47e   : > { %v974_v9 = vpop.f32.mrf.mxu3 }
 0x47f   : > { %v975_v10 = vadd.f32 %v1424_v8, %v974_v9 }
 0x481   : > { %v1160_v27 = vmul.f32 -1.442695, %v975_v10 }
 0x483   : > { %1445 = vpow2.f32 %v1160_v27 }
 0x486   : > { %v977_v12 = vpop.f32.mrf.mxu3 }
 0x487   : > { %v978_v13 = vadd.f32 %v1424_v8, %v977_v12 }
 0x489   : > { %v1446_v41 = vpop.eup %1445  ;;  %v1161_v44 = vmul.f32 -1.442695, %v978_v13 }
 0x48a   : > { %v986_v14 = vadd.f32 1.0, %v1446_v41 }
 0x48b   : > { %1447 = vpow2.f32 %v1161_v44 }
 0x48c   : > { %1449 = vrcp.f32 %v986_v14  ;;  %v999_v19 = vand.u32 2147483648, %v986_v14  ;;  %v997_v36 = vand.u32 2147483647, %v986_v14  ;;  %vm993_vm3 = vweird.f32 %v986_v14 }
 0x48e   : > { %v1000_v23 = vor.u32 1.1754944e-38, %v999_v19  ;;  %vm998_vm6 = vcmp.eq.f32.partialorder %v997_v36, 8.507059e+37 }
 0x491   : > { %v1448_v15 = vpop.eup %1447 }
 0x492   : > { %v1450_v31 = vpop.eup %1449  ;;  %v987_v48 = vadd.f32 1.0, %v1448_v15 }
 0x493   : > { %v989_v17 = vmul.f32 %v1450_v31, %v986_v14  ;;  %vm994_vm2 = vweird.f32 %v1450_v31 }
 0x494   : > { %1451 = vrcp.f32 %v987_v48  ;;  %vm995_vm5 = vmor %vm993_vm3, %vm994_vm2  ;;  %v1014_v40 = vand.u32 2147483648, %v987_v48  ;;  %v1012_v43 = vand.u32 2147483647, %v987_v48  ;;  %vm1008_vm10 = vweird.f32 %v987_v48 }
 0x495   : > { %v990_v28 = vsub.f32 1.0, %v989_v17 }
 0x496   : > { %v1015_v46 = vor.u32 1.1754944e-38, %v1014_v40  ;;  %vm1013_vm12 = vcmp.eq.f32.partialorder %v1012_v43, 8.507059e+37 }
 0x497   : > { %v991_v20 = vmul.f32 %v1450_v31, %v990_v28 }
 0x499   : > { %v992_v21 = vadd.f32 %v1450_v31, %v991_v20 }
 0x49a   : > { %v1452_v22 = vpop.eup %1451 }
 0x49b   : > { %v996_v25 = vsel %vm995_vm5, %v1450_v31, %v992_v21  ;;  %v1004_v24 = vmul.f32 %v1452_v22, %v987_v48  ;;  %vm1009_vm7 = vweird.f32 %v1452_v22 }
 0x49c   : > { %v1001_v29 = vsel %vm998_vm6, %v1000_v23, %v996_v25  ;;  %vm1010_vm11 = vmor %vm1008_vm10, %vm1009_vm7 }
 0x49d   : > { %v1048_v30 = vsel %vm1046_vm4, %v1001_v29, 0.0  ;;  %v1005_v32 = vsub.f32 1.0, %v1004_v24 }
 0x49e   : > { %1050 = vadd.xlane.f32.xlu2 %v1048_v30 }
 0x49f   : > { %v1006_v42 = vmul.f32 %v1452_v22, %v1005_v32 }
 0x4a1   : > { %v1007_v45 = vadd.f32 %v1452_v22, %v1006_v42 }
 0x4a3   : > { %v1011_v47 = vsel %vm1010_vm11, %v1452_v22, %v1007_v45 }
 0x4a4   : > { %v1016_v49 = vsel %vm1013_vm12, %v1015_v46, %v1011_v47 }
 0x4a5   : > { %v1049_v50 = vsel %vm1047_vm13, %v1016_v49, 0.0 }
 0x4a6   : > { %1052 = vadd.xlane.f32.xlu2 %v1049_v50 }
 0x511   : > { %v1051_v51 = vpop.xlane.xlu2 %1050 }
 0x512   : > { %1055 = vst.msk [vmem:[%s265_s7] sm:$0xff] %vm1054_vm14, %v1051_v51 }
 0x519   : > { %v1053_v52 = vpop.xlane.xlu2 %1052 }
 0x51a   : > { %1056 = vst.msk [vmem:[%s265_s7 + $0x8] sm:$0xff] %vm1054_vm14, %v1053_v52 }
 0x51b PF: > { %s16_s18 = sadd.s32 1, %s1493_s18  }
 0x51c   : > { %p13_p7 = scmp.ge.s32.totalorder %s16_s18, 10  }
 0x51e   :  { %15 = sbr.rel (!%p13_p7) target bundleno = 1 (0x1), region = 78 }
 0x523   :  { %1079 = vsyncpa [#allocation3], 1 }
 0x524   :  { %1081 = vsyncpa [#allocation3 + $0x1], 1 }

</bundles_post_ra>
